<compile_context>
chip_gen: v7x
topology: tpu7x:2x2x1
jax: 0.10.0
libtpu: 0.0.40
codegen_flags: <defaults>
</compile_context>

<pallas_src>
import functools
import numpy as np
import jax
import jax.numpy as jnp
from jax.experimental import pallas as pl
from jax.experimental.pallas import tpu as pltpu


def _round_up(x: int, m: int) -> int:
    return ((x + m - 1) // m) * m


# --------------------------------------------------------------------------
# Fused per-(teacher, student) pair kernel.
#   grid = (2 teacher crops  [parallel],  num_crops - 1 pairs per teacher [arbitrary])
# --------------------------------------------------------------------------
def _ddino_pair_kernel(s_map_ref, s_vlen_ref,              # scalar prefetch (SMEM int32)
                       temps_ref,                          # SMEM f32: [teacher_temp, student_temp]
                       center_ref, center_grid_ref,        # (1, D) VMEM
                       t_cls_ref, t_reg_ref, t_fea_ref,    # teacher blocks (crop dim squeezed)
                       s_cls_ref, s_reg_ref, s_fea_ref,    # student blocks (crop dim squeezed)
                       out_ref,                            # (8, 128) per-teacher accumulator
                       t_prob_sc, t_regp_sc, t_fn_sc,      # VMEM scratch: cached teacher work
                       *, n_teacher_patches):
    t = pl.program_id(0)          # teacher crop index
    j = pl.program_id(1)          # student-pair index for this teacher
    teacher_temp = temps_ref[0]
    student_temp = temps_ref[1]

    # ---- teacher-only work: computed once per teacher crop, cached in scratch ----
    @pl.when(j == 0)
    def _():
        t_cls = t_cls_ref[...]                                            # (B, D)
        t_prob_sc[...] = jax.nn.softmax(
            (t_cls - center_ref[...]) / teacher_temp, axis=-1)
        t_reg = t_reg_ref[...]                                            # (B, Np, D)
        t_regp_sc[...] = jax.nn.softmax(
            (t_reg - center_grid_ref[...]) / teacher_temp, axis=-1)
        t_f = t_fea_ref[...]                                              # (B, Np, F)
        # F.normalize(p=2): x * rsqrt(max(sum(x^2), eps^2)); rsqrt runs on the EUP.
        t_inv = jax.lax.rsqrt(jnp.maximum(jnp.sum(t_f * t_f, axis=-1, keepdims=True),
                                          jnp.float32(1e-24)))
        t_fn_sc[...] = (t_f * t_inv).astype(jnp.bfloat16)                 # bf16 for the MXU

    # ---- per-(teacher, student) pair ----
    s_valid = s_vlen_ref[t, j]                                            # true #patches of this crop

    # CLS cross-entropy + L1 term
    t_prob = t_prob_sc[...]                                               # (B, D)
    s_cls = s_cls_ref[...] / student_temp                                 # (B, D)
    s_logp = jax.nn.log_softmax(s_cls, axis=-1)
    ce_cls = 0.5 * jnp.sum(-t_prob * s_logp, axis=-1, keepdims=True)      # (B, 1)
    l1 = 0.005 * jnp.mean(jnp.abs(t_prob - s_cls))                        # scalar

    # Region term
    s_reg = s_reg_ref[...] / student_temp                                 # (B, Sp, D)
    s_reg_logp = jax.nn.log_softmax(s_reg, axis=-1)

    s_f = s_fea_ref[...]                                                  # (B, Sp, F)
    s_inv = jax.lax.rsqrt(jnp.maximum(jnp.sum(s_f * s_f, axis=-1, keepdims=True),
                                      jnp.float32(1e-24)))
    s_fn = (s_f * s_inv).astype(jnp.bfloat16)

    # cosine similarity on the MXU (bf16 x bf16 -> f32 acc); lane-dense padded Np
    sim = jnp.einsum('bsf,bnf->bsn', s_fn, t_fn_sc[...],
                     preferred_element_type=jnp.float32)                  # (B, Sp, Np)
    B, Sp, Np = sim.shape
    iota_n = jax.lax.broadcasted_iota(jnp.int32, (B, Sp, Np), 2)
    sim = jnp.where(iota_n < n_teacher_patches, sim, jnp.float32(-1e30))  # mask padded teacher patches
    sim_max = jnp.max(sim, axis=-1, keepdims=True)                        # (B, Sp, 1)
    first_idx = jnp.min(jnp.where(sim >= sim_max, iota_n, Np),
                        axis=-1, keepdims=True)                           # first argmax index
    onehot = (iota_n == first_idx).astype(jnp.float32)                    # (B, Sp, Np)

    # torch.gather along the patch dim as a one-hot matmul (exact in f32)
    teacher_indexed = jnp.einsum('bsn,bnd->bsd', onehot, t_regp_sc[...],
                                 preferred_element_type=jnp.float32)      # (B, Sp, D)

    region_ce = jnp.sum(-teacher_indexed * s_reg_logp, axis=-1)           # (B, Sp)
    iota_s = jax.lax.broadcasted_iota(jnp.int32, (B, Sp), 1)
    valid = (iota_s < s_valid).astype(jnp.float32)                        # mask padded student patches
    region_term = 0.5 * (jnp.sum(region_ce * valid, axis=-1, keepdims=True)
                         / s_valid.astype(jnp.float32))                   # (B, 1)  == mean over valid

    pair_loss = jnp.mean(ce_cls + region_term) + l1                       # scalar

    # accumulate across the student-pair axis into a lane-dense per-teacher block
    contrib = jnp.broadcast_to(pair_loss, out_ref.shape)

    @pl.when(j == 0)
    def _():
        out_ref[...] = contrib

    @pl.when(j != 0)
    def _():
        out_ref[...] = out_ref[...] + contrib


# --------------------------------------------------------------------------
# Jitted forward: stack/pad glue + one pallas_call + center EMA (plain JAX)
# --------------------------------------------------------------------------
@functools.partial(jax.jit,
                   static_argnames=("num_crops", "n_teacher_patches", "student_patch_sizes"))
def _ddino_loss_l1_forward(student_cls, student_reg, student_fea,
                           teacher_cls, teacher_reg, teacher_fea,
                           center, center_grid, temps, center_momentum,
                           *, num_crops, n_teacher_patches, student_patch_sizes):
    D = teacher_cls.shape[-1]
    Fd = teacher_fea.shape[-1]
    N = n_teacher_patches
    B = teacher_cls.shape[0] // 2
    sizes = student_patch_sizes
    P = num_crops - 1

    # ---------- glue: per-crop views, padded to kernel-friendly shapes ----------
    t_cls_g = teacher_cls.reshape(2, B, D)
    t_reg_g = teacher_reg.reshape(2, B, N, D)
    t_fea_g = teacher_fea.reshape(2, B, N, Fd)
    N_pad = _round_up(N, 128)                       # lane-dense teacher-patch axis
    if N_pad != N:
        t_reg_g = jnp.pad(t_reg_g, ((0, 0), (0, 0), (0, N_pad - N), (0, 0)))
        t_fea_g = jnp.pad(t_fea_g, ((0, 0), (0, 0), (0, N_pad - N), (0, 0)))

    s_cls_g = student_cls.reshape(num_crops, B, D)
    S_pad = _round_up(max(sizes), 8)                # one shape for global + local crops
    s_reg_l, s_fea_l = [], []
    off = 0
    for s in sizes:
        rows = s * B
        r = student_reg[off:off + rows].reshape(B, s, D)
        f = student_fea[off:off + rows].reshape(B, s, Fd)
        if S_pad != s:
            r = jnp.pad(r, ((0, 0), (0, S_pad - s), (0, 0)))
            f = jnp.pad(f, ((0, 0), (0, S_pad - s), (0, 0)))
        s_reg_l.append(r)
        s_fea_l.append(f)
        off += rows
    s_reg_g = jnp.stack(s_reg_l)                    # (num_crops, B, S_pad, D)
    s_fea_g = jnp.stack(s_fea_l)                    # (num_crops, B, S_pad, F)

    # (teacher, pair) -> student crop index / valid patch count (scalar prefetch)
    s_map = jnp.asarray(
        [[s for s in range(num_crops) if s != t] for t in range(2)], jnp.int32)
    s_vlen = jnp.asarray(
        [[sizes[s] for s in range(num_crops) if s != t] for t in range(2)], jnp.int32)

    kern = functools.partial(_ddino_pair_kernel, n_teacher_patches=N)
    grid_spec = pltpu.PrefetchScalarGridSpec(
        num_scalar_prefetch=2,
        grid=(2, P),
        in_specs=[
            pl.BlockSpec(memory_space=pltpu.MemorySpace.SMEM),                      # temps
            pl.BlockSpec((1, D), lambda t, j, sm, sl: (0, 0)),                      # center
            pl.BlockSpec((1, D), lambda t, j, sm, sl: (0, 0)),                      # center_grid
            pl.BlockSpec((None, B, D), lambda t, j, sm, sl: (t, 0, 0)),             # teacher cls
            pl.BlockSpec((None, B, N_pad, D), lambda t, j, sm, sl: (t, 0, 0, 0)),   # teacher region
            pl.BlockSpec((None, B, N_pad, Fd), lambda t, j, sm, sl: (t, 0, 0, 0)),  # teacher features
            pl.BlockSpec((None, B, D), lambda t, j, sm, sl: (sm[t, j], 0, 0)),      # student cls
            pl.BlockSpec((None, B, S_pad, D),
                         lambda t, j, sm, sl: (sm[t, j], 0, 0, 0)),                 # student region
            pl.BlockSpec((None, B, S_pad, Fd),
                         lambda t, j, sm, sl: (sm[t, j], 0, 0, 0)),                 # student features
        ],
        out_specs=pl.BlockSpec((None, 8, 128), lambda t, j, sm, sl: (t, 0, 0)),
        scratch_shapes=[
            pltpu.VMEM((B, D), jnp.float32),           # cached teacher cls softmax
            pltpu.VMEM((B, N_pad, D), jnp.float32),    # cached teacher region softmax
            pltpu.VMEM((B, N_pad, Fd), jnp.bfloat16),  # cached normalized teacher features
        ],
    )
    out = pl.pallas_call(
        kern,
        out_shape=jax.ShapeDtypeStruct((2, 8, 128), jnp.float32),
        grid_spec=grid_spec,
        compiler_params=pltpu.CompilerParams(
            dimension_semantics=("parallel", "arbitrary"),   # teacher axis -> 2 TCs on v7x
            vmem_limit_bytes=32 * 1024 * 1024),               # explicit; safe on v5e/v6e/v7x
    )(s_map, s_vlen, temps, center, center_grid,
      t_cls_g, t_reg_g, t_fea_g, s_cls_g, s_reg_g, s_fea_g)

    total_loss = jnp.sum(out[:, 0, 0]) / (2 * P)

    # center EMA in plain JAX (memory-bound (1, D) axpy; XLA fuses it, no extra launch)
    m = center_momentum
    new_center = center * m + jnp.mean(teacher_cls, axis=0, keepdims=True) * (1.0 - m)
    new_center_grid = center_grid * m + jnp.mean(teacher_reg, axis=0, keepdims=True) * (1.0 - m)
    return total_loss, new_center, new_center_grid


# --------------------------------------------------------------------------
# Module-equivalent wrapper (buffers held explicitly; EMA update stored back)
# --------------------------------------------------------------------------
class DDINOLossL1:
    def __init__(self, output_dim, num_crops, warmup_teacher_temp, teacher_temp,
                 warmup_teacher_temp_epochs, nepochs,
                 student_temp=0.1, center_momentum=0.9):
        self.num_crops = num_crops
        self.student_temp = student_temp
        self.center_momentum = center_momentum
        self.center = jnp.zeros((1, output_dim), jnp.float32)
        self.center_grid = jnp.zeros((1, output_dim), jnp.float32)
        self.teacher_temp_schedule = np.concatenate((
            np.linspace(warmup_teacher_temp, teacher_temp, warmup_teacher_temp_epochs),
            np.ones(nepochs - warmup_teacher_temp_epochs) * teacher_temp))

    def __call__(self, student_output, teacher_output, epoch):
        student_cls, student_reg, student_fea, student_npatch = student_output
        teacher_cls, teacher_reg, teacher_fea, teacher_npatch = teacher_output
        teacher_temp = float(self.teacher_temp_schedule[epoch])
        N = int(teacher_npatch[0])
        sizes = tuple([int(student_npatch[0])] * 2
                      + [int(student_npatch[1])] * (self.num_crops - 2))
        temps = jnp.array([teacher_temp, self.student_temp], jnp.float32)

        loss, self.center, self.center_grid = _ddino_loss_l1_forward(
            student_cls, student_reg, student_fea,
            teacher_cls, teacher_reg, teacher_fea,
            self.center, self.center_grid, temps,
            jnp.float32(self.center_momentum),
            num_crops=self.num_crops, n_teacher_patches=N,
            student_patch_sizes=sizes)
        return loss


# --------------------------------------------------------------------------
# Pure-JAX reference (mirrors the PyTorch forward) for validation.
# The similarity matmul uses the same bf16 feature precision as the kernel
# (it only feeds the argmax patch selection), so index decisions match.
# --------------------------------------------------------------------------
def reference_forward(student_output, teacher_output, epoch, center, center_grid,
                      num_crops, teacher_temp_schedule, student_temp):
    s_cls_all, s_reg_all, s_fea_all, s_npatch = student_output
    t_cls_all, t_reg_all, t_fea_all, t_npatch = teacher_output
    tt = float(teacher_temp_schedule[epoch])
    t_out = jnp.split(jax.nn.softmax((t_cls_all - center) / tt, axis=-1), 2, axis=0)
    t_region = jnp.split(jax.nn.softmax((t_reg_all - center_grid) / tt, axis=-1), 2, axis=0)
    t_fea = jnp.split(t_fea_all, 2, axis=0)
    N = int(t_npatch[0])
    B = t_region[0].shape[0] // N
    s_out = jnp.split(s_cls_all / student_temp, num_crops, axis=0)
    sizes = [int(s_npatch[0])] * 2 + [int(s_npatch[1])] * (num_crops - 2)
    sizes_bs = [s * B for s in sizes]
    splits = [int(x) for x in np.cumsum(sizes_bs)[:-1]]
    s_region = jnp.split(s_reg_all / student_temp, splits, axis=0)
    s_fea = jnp.split(s_fea_all, splits, axis=0)

    def l2norm(x):
        n = jnp.sqrt(jnp.sum(x * x, axis=-1, keepdims=True))
        return x / jnp.maximum(n, 1e-12)

    total = jnp.float32(0.0)
    n_terms = 0
    for ti, t in enumerate(t_out):
        for si, s in enumerate(s_out):
            if si == ti:
                continue
            loss = 0.5 * jnp.sum(-t * jax.nn.log_softmax(s, axis=-1), axis=-1)
            loss = loss + 0.005 * jnp.mean(jnp.abs(t - s))
            sr = s_region[si].reshape(B, sizes[si], -1)
            sf = s_fea[si].reshape(B, sizes[si], -1)
            tr = t_region[ti].reshape(B, N, -1)
            tf = t_fea[ti].reshape(B, N, -1)
            sim = jnp.einsum('bsf,bnf->bsn',
                             l2norm(sf).astype(jnp.bfloat16),
                             l2norm(tf).astype(jnp.bfloat16),
                             preferred_element_type=jnp.float32)
            idx = jnp.argmax(sim, axis=2)
            t_indexed = jnp.take_along_axis(tr, idx[:, :, None], axis=1)
            loss = loss + 0.5 * jnp.mean(
                jnp.sum(-t_indexed * jax.nn.log_softmax(sr, axis=-1), axis=-1), axis=-1)
            total = total + jnp.mean(loss)
            n_terms += 1
    return total / n_terms


# --------------------------------------------------------------------------
# Example run
# --------------------------------------------------------------------------
if __name__ == "__main__":
    D = 128          # output_dim
    Fd = 64          # feature dim
    num_crops = 4    # 2 global + 2 local crops
    B = 2            # batch size
    N1 = 16          # patches per global crop
    N2 = 8           # patches per local crop

    key = jax.random.PRNGKey(0)
    k = jax.random.split(key, 6)
    total_s_patches = B * (2 * N1 + (num_crops - 2) * N2)
    student_cls = jax.random.normal(k[0], (num_crops * B, D), jnp.float32)
    student_reg = jax.random.normal(k[1], (total_s_patches, D), jnp.float32)
    student_fea = jax.random.normal(k[2], (total_s_patches, Fd), jnp.float32)
    teacher_cls = jax.random.normal(k[3], (2 * B, D), jnp.float32)
    teacher_reg = jax.random.normal(k[4], (2 * B * N1, D), jnp.float32)
    teacher_fea = jax.random.normal(k[5], (2 * B * N1, Fd), jnp.float32)

    student_output = (student_cls, student_reg, student_fea, [N1, N2])
    teacher_output = (teacher_cls, teacher_reg, teacher_fea, [N1])
    epoch = 3

    loss_mod = DDINOLossL1(output_dim=D, num_crops=num_crops,
                           warmup_teacher_temp=0.04, teacher_temp=0.07,
                           warmup_teacher_temp_epochs=5, nepochs=10)
    center0, center_grid0 = loss_mod.center, loss_mod.center_grid

    loss = loss_mod(student_output, teacher_output, epoch)
    loss = jax.block_until_ready(loss)
    jax.block_until_ready(loss_mod.center)
    jax.block_until_ready(loss_mod.center_grid)

    # validate against pure-JAX reference
    ref_loss = jax.block_until_ready(reference_forward(
        student_output, teacher_output, epoch, center0, center_grid0,
        num_crops, loss_mod.teacher_temp_schedule, loss_mod.student_temp))
    ref_center = center0 * 0.9 + jnp.mean(teacher_cls, axis=0, keepdims=True) * 0.1
    ref_center_grid = center_grid0 * 0.9 + jnp.mean(teacher_reg, axis=0, keepdims=True) * 0.1

    assert np.allclose(np.asarray(loss), np.asarray(ref_loss), rtol=1e-2, atol=1e-3), \
        (float(loss), float(ref_loss))
    assert np.allclose(np.asarray(loss_mod.center), np.asarray(ref_center), atol=1e-5)
    assert np.allclose(np.asarray(loss_mod.center_grid), np.asarray(ref_center_grid), atol=1e-5)

    print("KERNEL_OK")
</pallas_src>

<mosaic_0001>
module attributes {stable_mosaic.version = 11 : i64} {
  func.func @_ddino_pair_kernel(%arg0: i32, %arg1: i32, %arg2: memref<2x3xi32, #tpu.memory_space<smem>>, %arg3: memref<2x3xi32, #tpu.memory_space<smem>>, %arg4: memref<2xf32, #tpu.memory_space<smem>>, %arg5: memref<1x128xf32, #tpu.memory_space<vmem>>, %arg6: memref<1x128xf32, #tpu.memory_space<vmem>>, %arg7: memref<1x2x128xf32, #tpu.memory_space<vmem>>, %arg8: memref<1x2x128x128xf32, #tpu.memory_space<vmem>>, %arg9: memref<1x2x128x64xf32, #tpu.memory_space<vmem>>, %arg10: memref<1x2x128xf32, #tpu.memory_space<vmem>>, %arg11: memref<1x2x16x128xf32, #tpu.memory_space<vmem>>, %arg12: memref<1x2x16x64xf32, #tpu.memory_space<vmem>>, %arg13: memref<1x8x128xf32, #tpu.memory_space<vmem>>, %arg14: memref<2x128xf32, #tpu.memory_space<vmem>>, %arg15: memref<2x128x128xf32, #tpu.memory_space<vmem>>, %arg16: memref<2x128x64xbf16, #tpu.memory_space<vmem>>) attributes {dimension_semantics = [#tpu.dimension_semantics<parallel>, #tpu.dimension_semantics<arbitrary>], iteration_bounds = array<i64: 2, 3>, scalar_prefetch = 2 : i64, scratch_operands = 3 : i64, tpu.core_type = #tpu.core_type<tc>, window_params = [{transform_indices = @transform_0, window_bounds = array<i64: 2>}, {pipeline_mode = #tpu.pipeline_mode<synchronous>, transform_indices = @transform_1, window_bounds = array<i64: 1, 128>}, {pipeline_mode = #tpu.pipeline_mode<synchronous>, transform_indices = @transform_2, window_bounds = array<i64: 1, 128>}, {transform_indices = @transform_3, window_bounds = array<i64: 1, 2, 128>}, {transform_indices = @transform_4, window_bounds = array<i64: 1, 2, 128, 128>}, {transform_indices = @transform_5, window_bounds = array<i64: 1, 2, 128, 64>}, {transform_indices = @transform_6, window_bounds = array<i64: 1, 2, 128>}, {transform_indices = @transform_7, window_bounds = array<i64: 1, 2, 16, 128>}, {transform_indices = @transform_8, window_bounds = array<i64: 1, 2, 16, 64>}, {transform_indices = @transform_9, window_bounds = array<i64: 1, 8, 128>}]} {
    %c0 = arith.constant 0 : index
    %0 = memref.load %arg4[%c0] : memref<2xf32, #tpu.memory_space<smem>>
    %c1 = arith.constant 1 : index
    %1 = memref.load %arg4[%c1] : memref<2xf32, #tpu.memory_space<smem>>
    %c0_i32 = arith.constant 0 : i32
    %2 = arith.cmpi eq, %arg1, %c0_i32 : i32
    %3 = arith.extui %2 : i1 to i32
    %c0_i32_0 = arith.constant 0 : i32
    %4 = arith.cmpi ne, %3, %c0_i32_0 : i32
    scf.if %4 {
      %c0_48 = arith.constant 0 : index
      %c0_49 = arith.constant 0 : index
      %c0_50 = arith.constant 0 : index
      %119 = vector.load %arg7[%c0_48, %c0_49, %c0_50] : memref<1x2x128xf32, #tpu.memory_space<vmem>>, vector<1x2x128xf32>
      %120 = vector.shape_cast %119 : vector<1x2x128xf32> to vector<2x128xf32>
      %c0_51 = arith.constant 0 : index
      %c0_52 = arith.constant 0 : index
      %121 = vector.load %arg5[%c0_51, %c0_52] : memref<1x128xf32, #tpu.memory_space<vmem>>, vector<1x128xf32>
      %122 = vector.broadcast %121 : vector<1x128xf32> to vector<2x128xf32>
      %123 = arith.subf %120, %122 : vector<2x128xf32>
      %124 = vector.broadcast %0 : f32 to vector<2x128xf32>
      %125 = arith.divf %123, %124 : vector<2x128xf32>
      %cst_53 = arith.constant dense<0xFF800000> : vector<2xf32>
      %126 = vector.multi_reduction <maximumf>, %125, %cst_53 [1] : vector<2x128xf32> to vector<2xf32>
      %cst_54 = arith.constant 0xFF800000 : f32
      %127 = vector.broadcast %cst_54 : f32 to vector<2xf32>
      %128 = arith.maximumf %127, %126 : vector<2xf32>
      %129 = vector.shape_cast %128 : vector<2xf32> to vector<2x1xf32>
      %130 = vector.broadcast %129 : vector<2x1xf32> to vector<2x128xf32>
      %131 = arith.subf %125, %130 : vector<2x128xf32>
      %132 = math.exp %131 : vector<2x128xf32>
      %cst_55 = arith.constant dense<0.000000e+00> : vector<2xf32>
      %133 = vector.multi_reduction <add>, %132, %cst_55 [1] : vector<2x128xf32> to vector<2xf32>
      %134 = vector.shape_cast %133 : vector<2xf32> to vector<2x1xf32>
      %135 = vector.broadcast %134 : vector<2x1xf32> to vector<2x128xf32>
      %136 = arith.divf %132, %135 : vector<2x128xf32>
      %c0_56 = arith.constant 0 : index
      %c0_57 = arith.constant 0 : index
      %137 = vector.load %arg14[%c0_56, %c0_57] : memref<2x128xf32, #tpu.memory_space<vmem>>, vector<2x128xf32>
      tpu.vector_store %arg14[%c0_56, %c0_57], %136 {strides = array<i32>} : memref<2x128xf32, #tpu.memory_space<vmem>>, vector<2x128xf32>,
      %c0_58 = arith.constant 0 : index
      %c0_59 = arith.constant 0 : index
      %c0_60 = arith.constant 0 : index
      %c0_61 = arith.constant 0 : index
      %138 = vector.load %arg8[%c0_58, %c0_59, %c0_60, %c0_61] : memref<1x2x128x128xf32, #tpu.memory_space<vmem>>, vector<1x2x128x128xf32>
      %139 = vector.shape_cast %138 : vector<1x2x128x128xf32> to vector<2x128x128xf32>
      %c0_62 = arith.constant 0 : index
      %c0_63 = arith.constant 0 : index
      %140 = vector.load %arg6[%c0_62, %c0_63] : memref<1x128xf32, #tpu.memory_space<vmem>>, vector<1x128xf32>
      %141 = vector.shape_cast %140 : vector<1x128xf32> to vector<1x1x128xf32>
      %142 = vector.broadcast %141 : vector<1x1x128xf32> to vector<2x128x128xf32>
      %143 = arith.subf %139, %142 : vector<2x128x128xf32>
      %144 = vector.broadcast %0 : f32 to vector<2x128x128xf32>
      %145 = arith.divf %143, %144 : vector<2x128x128xf32>
      %cst_64 = arith.constant dense<0xFF800000> : vector<2x128xf32>
      %146 = vector.multi_reduction <maximumf>, %145, %cst_64 [2] : vector<2x128x128xf32> to vector<2x128xf32>
      %cst_65 = arith.constant 0xFF800000 : f32
      %147 = vector.broadcast %cst_65 : f32 to vector<2x128xf32>
      %148 = arith.maximumf %147, %146 : vector<2x128xf32>
      %149 = vector.shape_cast %148 : vector<2x128xf32> to vector<2x128x1xf32>
      %150 = vector.broadcast %149 : vector<2x128x1xf32> to vector<2x128x128xf32>
      %151 = arith.subf %145, %150 : vector<2x128x128xf32>
      %152 = math.exp %151 : vector<2x128x128xf32>
      %cst_66 = arith.constant dense<0.000000e+00> : vector<2x128xf32>
      %153 = vector.multi_reduction <add>, %152, %cst_66 [2] : vector<2x128x128xf32> to vector<2x128xf32>
      %154 = vector.shape_cast %153 : vector<2x128xf32> to vector<2x128x1xf32>
      %155 = vector.broadcast %154 : vector<2x128x1xf32> to vector<2x128x128xf32>
      %156 = arith.divf %152, %155 : vector<2x128x128xf32>
      %c0_67 = arith.constant 0 : index
      %c0_68 = arith.constant 0 : index
      %c0_69 = arith.constant 0 : index
      %157 = vector.load %arg15[%c0_67, %c0_68, %c0_69] : memref<2x128x128xf32, #tpu.memory_space<vmem>>, vector<2x128x128xf32>
      tpu.vector_store %arg15[%c0_67, %c0_68, %c0_69], %156 {strides = array<i32>} : memref<2x128x128xf32, #tpu.memory_space<vmem>>, vector<2x128x128xf32>,
      %c0_70 = arith.constant 0 : index
      %c0_71 = arith.constant 0 : index
      %c0_72 = arith.constant 0 : index
      %c0_73 = arith.constant 0 : index
      %158 = vector.load %arg9[%c0_70, %c0_71, %c0_72, %c0_73] : memref<1x2x128x64xf32, #tpu.memory_space<vmem>>, vector<1x2x128x64xf32>
      %159 = vector.shape_cast %158 : vector<1x2x128x64xf32> to vector<2x128x64xf32>
      %160 = arith.mulf %159, %159 : vector<2x128x64xf32>
      %cst_74 = arith.constant dense<0.000000e+00> : vector<2x128xf32>
      %161 = vector.multi_reduction <add>, %160, %cst_74 [2] : vector<2x128x64xf32> to vector<2x128xf32>
      %162 = vector.shape_cast %161 : vector<2x128xf32> to vector<2x128x1xf32>
      %cst_75 = arith.constant 1.000000e-24 : f32
      %163 = vector.broadcast %cst_75 : f32 to vector<2x128x1xf32>
      %164 = arith.maximumf %162, %163 : vector<2x128x1xf32>
      %165 = math.rsqrt %164 : vector<2x128x1xf32>
      %166 = vector.broadcast %165 : vector<2x128x1xf32> to vector<2x128x64xf32>
      %167 = arith.mulf %159, %166 : vector<2x128x64xf32>
      %168 = arith.truncf %167 : vector<2x128x64xf32> to vector<2x128x64xbf16>
      %c0_76 = arith.constant 0 : index
      %c0_77 = arith.constant 0 : index
      %c0_78 = arith.constant 0 : index
      %169 = vector.load %arg16[%c0_76, %c0_77, %c0_78] : memref<2x128x64xbf16, #tpu.memory_space<vmem>>, vector<2x128x64xbf16>
      tpu.vector_store %arg16[%c0_76, %c0_77, %c0_78], %168 {strides = array<i32>} : memref<2x128x64xbf16, #tpu.memory_space<vmem>>, vector<2x128x64xbf16>,
    } else {
    }
    %5 = arith.index_cast %arg0 : i32 to index
    %6 = arith.index_cast %arg1 : i32 to index
    %7 = memref.load %arg3[%5, %6] : memref<2x3xi32, #tpu.memory_space<smem>>
    %c0_1 = arith.constant 0 : index
    %c0_2 = arith.constant 0 : index
    %8 = vector.load %arg14[%c0_1, %c0_2] : memref<2x128xf32, #tpu.memory_space<vmem>>, vector<2x128xf32>
    %c0_3 = arith.constant 0 : index
    %c0_4 = arith.constant 0 : index
    %c0_5 = arith.constant 0 : index
    %9 = vector.load %arg10[%c0_3, %c0_4, %c0_5] : memref<1x2x128xf32, #tpu.memory_space<vmem>>, vector<1x2x128xf32>
    %10 = vector.shape_cast %9 : vector<1x2x128xf32> to vector<2x128xf32>
    %11 = vector.broadcast %1 : f32 to vector<2x128xf32>
    %12 = arith.divf %10, %11 : vector<2x128xf32>
    %cst = arith.constant dense<0xFF800000> : vector<2xf32>
    %13 = vector.multi_reduction <maximumf>, %12, %cst [1] : vector<2x128xf32> to vector<2xf32>
    %cst_6 = arith.constant 0xFF800000 : f32
    %14 = vector.broadcast %cst_6 : f32 to vector<2xf32>
    %15 = arith.maximumf %14, %13 : vector<2xf32>
    %16 = vector.shape_cast %15 : vector<2xf32> to vector<2x1xf32>
    %17 = vector.broadcast %16 : vector<2x1xf32> to vector<2x128xf32>
    %18 = arith.subf %12, %17 : vector<2x128xf32>
    %19 = math.exp %18 : vector<2x128xf32>
    %cst_7 = arith.constant dense<0.000000e+00> : vector<2xf32>
    %20 = vector.multi_reduction <add>, %19, %cst_7 [1] : vector<2x128xf32> to vector<2xf32>
    %21 = vector.shape_cast %20 : vector<2xf32> to vector<2x1xf32>
    %22 = math.log %21 : vector<2x1xf32>
    %23 = vector.broadcast %22 : vector<2x1xf32> to vector<2x128xf32>
    %24 = arith.subf %18, %23 : vector<2x128xf32>
    %cst_8 = arith.constant 0.000000e+00 : f32
    %25 = vector.broadcast %cst_8 : f32 to vector<2x128xf32>
    %26 = arith.subf %25, %8 : vector<2x128xf32>
    %27 = arith.mulf %26, %24 : vector<2x128xf32>
    %cst_9 = arith.constant dense<0.000000e+00> : vector<2xf32>
    %28 = vector.multi_reduction <add>, %27, %cst_9 [1] : vector<2x128xf32> to vector<2xf32>
    %29 = vector.shape_cast %28 : vector<2xf32> to vector<2x1xf32>
    %cst_10 = arith.constant 5.000000e-01 : f32
    %30 = vector.broadcast %cst_10 : f32 to vector<2x1xf32>
    %31 = arith.mulf %30, %29 : vector<2x1xf32>
    %32 = arith.subf %8, %12 : vector<2x128xf32>
    %33 = math.absf %32 : vector<2x128xf32>
    %34 = vector.shape_cast %33 : vector<2x128xf32> to vector<1x2x128xf32>
    %cst_11 = arith.constant dense<0.000000e+00> : vector<1xf32>
    %35 = vector.multi_reduction <add>, %34, %cst_11 [1, 2] : vector<1x2x128xf32> to vector<1xf32>
    %36 = vector.shape_cast %35 : vector<1xf32> to vector<1x1x1xf32>
    %37 = vector.extract %36[0, 0, 0] : f32 from vector<1x1x1xf32>
    %cst_12 = arith.constant 2.560000e+02 : f32
    %38 = arith.divf %37, %cst_12 : f32
    %cst_13 = arith.constant 5.000000e-03 : f32
    %39 = arith.mulf %cst_13, %38 : f32
    %c0_14 = arith.constant 0 : index
    %c0_15 = arith.constant 0 : index
    %c0_16 = arith.constant 0 : index
    %c0_17 = arith.constant 0 : index
    %40 = vector.load %arg11[%c0_14, %c0_15, %c0_16, %c0_17] : memref<1x2x16x128xf32, #tpu.memory_space<vmem>>, vector<1x2x16x128xf32>
    %41 = vector.shape_cast %40 : vector<1x2x16x128xf32> to vector<2x16x128xf32>
    %42 = vector.broadcast %1 : f32 to vector<2x16x128xf32>
    %43 = arith.divf %41, %42 : vector<2x16x128xf32>
    %cst_18 = arith.constant dense<0xFF800000> : vector<2x16xf32>
    %44 = vector.multi_reduction <maximumf>, %43, %cst_18 [2] : vector<2x16x128xf32> to vector<2x16xf32>
    %cst_19 = arith.constant 0xFF800000 : f32
    %45 = vector.broadcast %cst_19 : f32 to vector<2x16xf32>
    %46 = arith.maximumf %45, %44 : vector<2x16xf32>
    %47 = vector.shape_cast %46 : vector<2x16xf32> to vector<2x16x1xf32>
    %48 = vector.broadcast %47 : vector<2x16x1xf32> to vector<2x16x128xf32>
    %49 = arith.subf %43, %48 : vector<2x16x128xf32>
    %50 = math.exp %49 : vector<2x16x128xf32>
    %cst_20 = arith.constant dense<0.000000e+00> : vector<2x16xf32>
    %51 = vector.multi_reduction <add>, %50, %cst_20 [2] : vector<2x16x128xf32> to vector<2x16xf32>
    %52 = vector.shape_cast %51 : vector<2x16xf32> to vector<2x16x1xf32>
    %53 = math.log %52 : vector<2x16x1xf32>
    %54 = vector.broadcast %53 : vector<2x16x1xf32> to vector<2x16x128xf32>
    %55 = arith.subf %49, %54 : vector<2x16x128xf32>
    %c0_21 = arith.constant 0 : index
    %c0_22 = arith.constant 0 : index
    %c0_23 = arith.constant 0 : index
    %c0_24 = arith.constant 0 : index
    %56 = vector.load %arg12[%c0_21, %c0_22, %c0_23, %c0_24] : memref<1x2x16x64xf32, #tpu.memory_space<vmem>>, vector<1x2x16x64xf32>
    %57 = vector.shape_cast %56 : vector<1x2x16x64xf32> to vector<2x16x64xf32>
    %58 = arith.mulf %57, %57 : vector<2x16x64xf32>
    %cst_25 = arith.constant dense<0.000000e+00> : vector<2x16xf32>
    %59 = vector.multi_reduction <add>, %58, %cst_25 [2] : vector<2x16x64xf32> to vector<2x16xf32>
    %60 = vector.shape_cast %59 : vector<2x16xf32> to vector<2x16x1xf32>
    %cst_26 = arith.constant 1.000000e-24 : f32
    %61 = vector.broadcast %cst_26 : f32 to vector<2x16x1xf32>
    %62 = arith.maximumf %60, %61 : vector<2x16x1xf32>
    %63 = math.rsqrt %62 : vector<2x16x1xf32>
    %64 = vector.broadcast %63 : vector<2x16x1xf32> to vector<2x16x64xf32>
    %65 = arith.mulf %57, %64 : vector<2x16x64xf32>
    %66 = arith.truncf %65 : vector<2x16x64xf32> to vector<2x16x64xbf16>
    %c0_27 = arith.constant 0 : index
    %c0_28 = arith.constant 0 : index
    %c0_29 = arith.constant 0 : index
    %67 = vector.load %arg16[%c0_27, %c0_28, %c0_29] : memref<2x128x64xbf16, #tpu.memory_space<vmem>>, vector<2x128x64xbf16>
    "tpu.trace_start"() <{level = 10 : i32, message = "bsf,bnf->bsn"}> : () -> ()
    %cst_30 = arith.constant dense<0.000000e+00> : vector<2x16x128xf32>
    %68 = tpu.matmul %66, %67, %cst_30 {dimension_numbers = #tpu.dot_dimension_numbers<[2], [2], [1], [1], [0, 0, 0, 1, 1, 1], [0], [0]>} : vector<2x16x64xbf16>, vector<2x128x64xbf16>, vector<2x16x128xf32> -> vector<2x16x128xf32>
    "tpu.trace_stop"() : () -> ()
    %69 = tpu.iota {dimensions = array<i32: 2>} : vector<2x16x128xi32>
    %c16_i32 = arith.constant 16 : i32
    %70 = vector.broadcast %c16_i32 : i32 to vector<2x16x128xi32>
    %71 = arith.cmpi slt, %69, %70 : vector<2x16x128xi32>
    %cst_31 = arith.constant -1.000000e+30 : f32
    %72 = vector.broadcast %cst_31 : f32 to vector<2x16x128xf32>
    %73 = arith.select %71, %68, %72 : vector<2x16x128xi1>, vector<2x16x128xf32>
    %cst_32 = arith.constant dense<0xFF800000> : vector<2x16xf32>
    %74 = vector.multi_reduction <maximumf>, %73, %cst_32 [2] : vector<2x16x128xf32> to vector<2x16xf32>
    %75 = vector.shape_cast %74 : vector<2x16xf32> to vector<2x16x1xf32>
    %76 = vector.broadcast %75 : vector<2x16x1xf32> to vector<2x16x128xf32>
    %77 = arith.cmpf oge, %73, %76 : vector<2x16x128xf32>
    %c128_i32 = arith.constant 128 : i32
    %78 = vector.broadcast %c128_i32 : i32 to vector<2x16x128xi32>
    %79 = arith.select %77, %69, %78 : vector<2x16x128xi1>, vector<2x16x128xi32>
    %cst_33 = arith.constant dense<2147483647> : vector<2x16xi32>
    %80 = vector.multi_reduction <minsi>, %79, %cst_33 [2] : vector<2x16x128xi32> to vector<2x16xi32>
    %81 = vector.shape_cast %80 : vector<2x16xi32> to vector<2x16x1xi32>
    %82 = vector.broadcast %81 : vector<2x16x1xi32> to vector<2x16x128xi32>
    %83 = arith.cmpi eq, %69, %82 : vector<2x16x128xi32>
    %84 = arith.extui %83 : vector<2x16x128xi1> to vector<2x16x128xi32>
    %85 = arith.sitofp %84 : vector<2x16x128xi32> to vector<2x16x128xf32>
    %c0_34 = arith.constant 0 : index
    %c0_35 = arith.constant 0 : index
    %c0_36 = arith.constant 0 : index
    %86 = vector.load %arg15[%c0_34, %c0_35, %c0_36] : memref<2x128x128xf32, #tpu.memory_space<vmem>>, vector<2x128x128xf32>
    "tpu.trace_start"() <{level = 10 : i32, message = "bsn,bnd->bsd"}> : () -> ()
    %cst_37 = arith.constant dense<0.000000e+00> : vector<2x16x128xf32>
    %87 = tpu.matmul %85, %86, %cst_37 {dimension_numbers = #tpu.dot_dimension_numbers<[2], [1], [1], [2], [0, 0, 0, 1, 1, 2], [0], [0]>} : vector<2x16x128xf32>, vector<2x128x128xf32>, vector<2x16x128xf32> -> vector<2x16x128xf32>
    "tpu.trace_stop"() : () -> ()
    %cst_38 = arith.constant 0.000000e+00 : f32
    %88 = vector.broadcast %cst_38 : f32 to vector<2x16x128xf32>
    %89 = arith.subf %88, %87 : vector<2x16x128xf32>
    %90 = arith.mulf %89, %55 : vector<2x16x128xf32>
    %cst_39 = arith.constant dense<0.000000e+00> : vector<2x16xf32>
    %91 = vector.multi_reduction <add>, %90, %cst_39 [2] : vector<2x16x128xf32> to vector<2x16xf32>
    %92 = tpu.iota {dimensions = array<i32: 1>} : vector<2x16xi32>
    %93 = vector.broadcast %7 : i32 to vector<2x16xi32>
    %94 = arith.cmpi slt, %92, %93 : vector<2x16xi32>
    %95 = arith.extui %94 : vector<2x16xi1> to vector<2x16xi32>
    %96 = arith.sitofp %95 : vector<2x16xi32> to vector<2x16xf32>
    %97 = arith.mulf %91, %96 : vector<2x16xf32>
    %cst_40 = arith.constant dense<0.000000e+00> : vector<2xf32>
    %98 = vector.multi_reduction <add>, %97, %cst_40 [1] : vector<2x16xf32> to vector<2xf32>
    %99 = vector.shape_cast %98 : vector<2xf32> to vector<2x1xf32>
    %100 = arith.sitofp %7 : i32 to f32
    %101 = vector.broadcast %100 : f32 to vector<2x1xf32>
    %102 = arith.divf %99, %101 : vector<2x1xf32>
    %cst_41 = arith.constant 5.000000e-01 : f32
    %103 = vector.broadcast %cst_41 : f32 to vector<2x1xf32>
    %104 = arith.mulf %103, %102 : vector<2x1xf32>
    %105 = arith.addf %31, %104 : vector<2x1xf32>
    %106 = vector.shape_cast %105 : vector<2x1xf32> to vector<1x2x1xf32>
    %cst_42 = arith.constant dense<0.000000e+00> : vector<1xf32>
    %107 = vector.multi_reduction <add>, %106, %cst_42 [1, 2] : vector<1x2x1xf32> to vector<1xf32>
    %108 = vector.shape_cast %107 : vector<1xf32> to vector<1x1x1xf32>
    %109 = vector.extract %108[0, 0, 0] : f32 from vector<1x1x1xf32>
    %cst_43 = arith.constant 2.000000e+00 : f32
    %110 = arith.divf %109, %cst_43 : f32
    %111 = arith.addf %110, %39 : f32
    %112 = vector.broadcast %111 : f32 to vector<8x128xf32>
    %c0_i32_44 = arith.constant 0 : i32
    %113 = arith.cmpi eq, %arg1, %c0_i32_44 : i32
    %114 = arith.extui %113 : i1 to i32
    %c0_i32_45 = arith.constant 0 : i32
    %115 = arith.cmpi ne, %114, %c0_i32_45 : i32
    scf.if %115 {
      %c0_48 = arith.constant 0 : index
      %c0_49 = arith.constant 0 : index
      %c0_50 = arith.constant 0 : index
      %119 = vector.load %arg13[%c0_48, %c0_49, %c0_50] : memref<1x8x128xf32, #tpu.memory_space<vmem>>, vector<1x8x128xf32>
      %120 = vector.shape_cast %119 : vector<1x8x128xf32> to vector<8x128xf32>
      %121 = vector.shape_cast %112 : vector<8x128xf32> to vector<1x8x128xf32>
      tpu.vector_store %arg13[%c0_48, %c0_49, %c0_50], %121 {strides = array<i32>} : memref<1x8x128xf32, #tpu.memory_space<vmem>>, vector<1x8x128xf32>,
    } else {
    }
    %c0_i32_46 = arith.constant 0 : i32
    %116 = arith.cmpi ne, %arg1, %c0_i32_46 : i32
    %117 = arith.extui %116 : i1 to i32
    %c0_i32_47 = arith.constant 0 : i32
    %118 = arith.cmpi ne, %117, %c0_i32_47 : i32
    scf.if %118 {
      %c0_48 = arith.constant 0 : index
      %c0_49 = arith.constant 0 : index
      %c0_50 = arith.constant 0 : index
      %119 = vector.load %arg13[%c0_48, %c0_49, %c0_50] : memref<1x8x128xf32, #tpu.memory_space<vmem>>, vector<1x8x128xf32>
      %120 = vector.shape_cast %119 : vector<1x8x128xf32> to vector<8x128xf32>
      %121 = arith.addf %120, %112 : vector<8x128xf32>
      %c0_51 = arith.constant 0 : index
      %c0_52 = arith.constant 0 : index
      %c0_53 = arith.constant 0 : index
      %122 = vector.load %arg13[%c0_51, %c0_52, %c0_53] : memref<1x8x128xf32, #tpu.memory_space<vmem>>, vector<1x8x128xf32>
      %123 = vector.shape_cast %122 : vector<1x8x128xf32> to vector<8x128xf32>
      %124 = vector.shape_cast %121 : vector<8x128xf32> to vector<1x8x128xf32>
      tpu.vector_store %arg13[%c0_51, %c0_52, %c0_53], %124 {strides = array<i32>} : memref<1x8x128xf32, #tpu.memory_space<vmem>>, vector<1x8x128xf32>,
    } else {
    }
    return
  }
  func.func @transform_0(%arg0: i32, %arg1: i32, %arg2: memref<2x3xi32, #tpu.memory_space<smem>>, %arg3: memref<2x3xi32, #tpu.memory_space<smem>>) -> i32 {
    %c0_i32 = arith.constant 0 : i32
    %c0_i32_0 = arith.constant 0 : i32
    return %c0_i32 : i32
  }
  func.func @transform_1(%arg0: i32, %arg1: i32, %arg2: memref<2x3xi32, #tpu.memory_space<smem>>, %arg3: memref<2x3xi32, #tpu.memory_space<smem>>) -> (i32, i32) {
    %c0_i32 = arith.constant 0 : i32
    %c0_i32_0 = arith.constant 0 : i32
    %c0_i32_1 = arith.constant 0 : i32
    return %c0_i32, %c0_i32_0 : i32, i32
  }
  func.func @transform_2(%arg0: i32, %arg1: i32, %arg2: memref<2x3xi32, #tpu.memory_space<smem>>, %arg3: memref<2x3xi32, #tpu.memory_space<smem>>) -> (i32, i32) {
    %c0_i32 = arith.constant 0 : i32
    %c0_i32_0 = arith.constant 0 : i32
    %c0_i32_1 = arith.constant 0 : i32
    return %c0_i32, %c0_i32_0 : i32, i32
  }
  func.func @transform_3(%arg0: i32, %arg1: i32, %arg2: memref<2x3xi32, #tpu.memory_space<smem>>, %arg3: memref<2x3xi32, #tpu.memory_space<smem>>) -> (i32, i32, i32) {
    %c0_i32 = arith.constant 0 : i32
    %c0_i32_0 = arith.constant 0 : i32
    %c0_i32_1 = arith.constant 0 : i32
    return %arg0, %c0_i32, %c0_i32_0 : i32, i32, i32
  }
  func.func @transform_4(%arg0: i32, %arg1: i32, %arg2: memref<2x3xi32, #tpu.memory_space<smem>>, %arg3: memref<2x3xi32, #tpu.memory_space<smem>>) -> (i32, i32, i32, i32) {
    %c0_i32 = arith.constant 0 : i32
    %c0_i32_0 = arith.constant 0 : i32
    %c0_i32_1 = arith.constant 0 : i32
    %c0_i32_2 = arith.constant 0 : i32
    return %arg0, %c0_i32, %c0_i32_0, %c0_i32_1 : i32, i32, i32, i32
  }
  func.func @transform_5(%arg0: i32, %arg1: i32, %arg2: memref<2x3xi32, #tpu.memory_space<smem>>, %arg3: memref<2x3xi32, #tpu.memory_space<smem>>) -> (i32, i32, i32, i32) {
    %c0_i32 = arith.constant 0 : i32
    %c0_i32_0 = arith.constant 0 : i32
    %c0_i32_1 = arith.constant 0 : i32
    %c0_i32_2 = arith.constant 0 : i32
    return %arg0, %c0_i32, %c0_i32_0, %c0_i32_1 : i32, i32, i32, i32
  }
  func.func @transform_6(%arg0: i32, %arg1: i32, %arg2: memref<2x3xi32, #tpu.memory_space<smem>>, %arg3: memref<2x3xi32, #tpu.memory_space<smem>>) -> (i32, i32, i32) {
    %0 = arith.index_cast %arg0 : i32 to index
    %1 = arith.index_cast %arg1 : i32 to index
    %2 = memref.load %arg2[%0, %1] : memref<2x3xi32, #tpu.memory_space<smem>>
    %c0_i32 = arith.constant 0 : i32
    %c0_i32_0 = arith.constant 0 : i32
    %c0_i32_1 = arith.constant 0 : i32
    return %2, %c0_i32, %c0_i32_0 : i32, i32, i32
  }
  func.func @transform_7(%arg0: i32, %arg1: i32, %arg2: memref<2x3xi32, #tpu.memory_space<smem>>, %arg3: memref<2x3xi32, #tpu.memory_space<smem>>) -> (i32, i32, i32, i32) {
    %0 = arith.index_cast %arg0 : i32 to index
    %1 = arith.index_cast %arg1 : i32 to index
    %2 = memref.load %arg2[%0, %1] : memref<2x3xi32, #tpu.memory_space<smem>>
    %c0_i32 = arith.constant 0 : i32
    %c0_i32_0 = arith.constant 0 : i32
    %c0_i32_1 = arith.constant 0 : i32
    %c0_i32_2 = arith.constant 0 : i32
    return %2, %c0_i32, %c0_i32_0, %c0_i32_1 : i32, i32, i32, i32
  }
  func.func @transform_8(%arg0: i32, %arg1: i32, %arg2: memref<2x3xi32, #tpu.memory_space<smem>>, %arg3: memref<2x3xi32, #tpu.memory_space<smem>>) -> (i32, i32, i32, i32) {
    %0 = arith.index_cast %arg0 : i32 to index
    %1 = arith.index_cast %arg1 : i32 to index
    %2 = memref.load %arg2[%0, %1] : memref<2x3xi32, #tpu.memory_space<smem>>
    %c0_i32 = arith.constant 0 : i32
    %c0_i32_0 = arith.constant 0 : i32
    %c0_i32_1 = arith.constant 0 : i32
    %c0_i32_2 = arith.constant 0 : i32
    return %2, %c0_i32, %c0_i32_0, %c0_i32_1 : i32, i32, i32, i32
  }
  func.func @transform_9(%arg0: i32, %arg1: i32, %arg2: memref<2x3xi32, #tpu.memory_space<smem>>, %arg3: memref<2x3xi32, #tpu.memory_space<smem>>) -> (i32, i32, i32) {
    %c0_i32 = arith.constant 0 : i32
    %c0_i32_0 = arith.constant 0 : i32
    %c0_i32_1 = arith.constant 0 : i32
    return %arg0, %c0_i32, %c0_i32_0 : i32, i32, i32
  }
}

</mosaic_0001>

<bundles_post_ra>
// kernel: _ddino_loss_l1_forward.1
= control target key start
LH: loop header
LB: loop body
LE: loop exit
PB: predicated region body
PF: predicated region fallthrough
CT: control target
= control target key end

     0   :  { %s3795_s0 = inlined_call_operand.vmem [shape: s32[2,3], index: 0, kind: input, shape index: {}]   ;;  %s3796_s2 = inlined_call_operand.vmem [shape: f32[2], index: 2, kind: input, shape index: {}]   ;;  %s3797_s3 = inlined_call_operand.vmem [shape: f32[1,128], index: 3, kind: input, shape index: {}]   ;;  %s3798_s4 = inlined_call_operand.vmem [shape: f32[1,128], index: 4, kind: input, shape index: {}]   ;;  %s3799_s5 = inlined_call_operand.vmem [shape: f32[2,2,128], index: 5, kind: input, shape index: {}]   ;;  %s3800_s6 = inlined_call_operand.vmem [shape: f32[2,2,128,128], index: 6, kind: input, shape index: {}]   ;;  %s3801_s7 = inlined_call_operand.vmem [shape: f32[2,2,128,64], index: 7, kind: input, shape index: {}]   ;;  %s3802_s8 = inlined_call_operand.vmem [shape: f32[4,2,128], index: 8, kind: input, shape index: {}]   ;;  %s3803_s9 = inlined_call_operand.vmem [shape: f32[4,2,16,128], index: 9, kind: input, shape index: {}]   ;;  %s3804_s10 = inlined_call_operand.vmem [shape: f32[4,2,16,64], index: 10, kind: input, shape index: {}]   ;;  %s3805_s11 = inlined_call_operand.vmem [shape: f32[2,8,128], index: 11, kind: output, shape index: {}]   ;;  %s3806_s1 = inlined_call_operand.vmem [shape: s32[2,3], index: 1, kind: input, shape index: {}]  }
   0x1   :  { %3824 = sst [smem:[#allocation31_spill]] %s3796_s2  ;;  %s16_s19 = sshll.u32 %s3795_s0, 4  ;;  %s17_s19 = int_to_ptr.vmem [resolvable:$true] %s16_s19 }
   0x2   :  { %3825 = sst [smem:[#allocation32_spill]] %s3799_s5  ;;  %s20_s22 = sshll.u32 %s3806_s1, 4  ;;  %s21_s22 = int_to_ptr.vmem [resolvable:$true] %s20_s22 }
   0x3   :  { %3826 = sst [smem:[#allocation33_spill]] %s3800_s6  ;;  %s2749_s23 = scalar_lea.vmem %s17_s19, 32 }
   0x4   :  { %3827 = sst [smem:[#allocation34_spill]] %s3801_s7  ;;  %p2750_p0 = scmp.ne.s32.totalorder %s17_s19, %s2749_s23 }
   0x5   :  { %3828 = sst [smem:[#allocation35_spill]] %s3805_s11  ;;  %p2754_p1 = scmp.lt.s32.totalorder %s17_s19, %s17_s19 }
   0x6   :  { %p2755_p2 = scmp.lt.s32.totalorder %s2749_s23, %s2749_s23 }
   0x8   :  { %p2756_p3 = por %p2755_p2, %p2754_p1 }
   0xa   :  { %p2757_p4 = pnand %p2756_p3, %p2750_p0 }
   0xc   :  { %2760 = shalt.err (!%p2757_p4)  }
   0xd   :  { %s2834_s24 = smov [#allocation6]   ;;  %s2761_s25 = scalar_lea.vmem %s21_s22, 32 }
   0xe   :  { %19 = dma.vmem_to_smem %s17_s19, 32, %s2834_s24, [#allocation5] }
   0xf   :  { %p2762_p5 = scmp.ne.s32.totalorder %s21_s22, %s2761_s25  ;;  %p2766_p6 = scmp.lt.s32.totalorder %s21_s22, %s21_s22 }
  0x10   :  { %p2767_p7 = scmp.lt.s32.totalorder %s2761_s25, %s2761_s25 }
  0x12   :  { %p2768_p8 = por %p2767_p7, %p2766_p6 }
  0x14   :  { %p2769_p9 = pnand %p2768_p8, %p2762_p5 }
  0x16   :  { %2772 = shalt.err (!%p2769_p9)  }
  0x17   :  { %s2835_s0 = smov [#allocation7]  }
  0x18   :  { %23 = dma.vmem_to_smem %s21_s22, 32, %s2835_s0, [#allocation5] }
  0x19   :  { %2808 = dma.done.wait [#allocation5], 64 }
  0x1a   :  { %2809 = vsyncadd [#allocation5], 4294967232 }
  0x1b   :  { %25 = sfence }
  0x1c   :  { %26 = vsyncpa [#allocation9], 0  ;;  %s2907_s1 = smov 0   ;;  %s2909_s26 = smov 0  }
  0x1d   :  { %s2911_s27 = smov 0   ;;  %s2913_s28 = smov 0  }
  0x1e   :  { %s2915_s29 = smov 0  }
  0x1f LB: > { %s2178_s30 = sadd.s32 4294967295, %s2832_s29   ;;  %s41_s12 = sadd.s32 1, %s2824_s27  ;;  %s2832_s29 = sphi %s2915_s29, %s32_s29   ;;  %s2828_s28 = sphi %s2913_s28, %s3877_s28   ;;  %s2824_s27 = sphi %s2911_s27, %s3876_s27   ;;  %s2820_s26 = sphi %s2909_s26, %s3875_s26   ;;  %s2816_s1 = sphi %s2907_s1, %s3874_s1  }
  0x20   : > { %p42_p10 = scmp.ge.s32.totalorder %s41_s12, 3  ;;  %s44_s13 = sadd.s32 1, %s2828_s28 }
  0x21   : > { %p2186_p11 = scmp.ge.s32.totalorder %s2832_s29, 1  ;;  %p342_p12 = scmp.lt.s32.totalorder %s2832_s29, 7 }
  0x22   : > { %s3879_s12 = smov (%p42_p10, %s41_s12), 0  ;;  %s3881_s13 = smov (!%p42_p10, %s44_s13), %s2828_s28 }
  0x23   : > { %3829 = sst [smem:[#allocation12_spill]] %s3879_s12  ;;  %p2940_p13 = pnand %p2186_p11, %p342_p12 }
  0x24   : > { %p46_p0 = scmp.ge.s32.totalorder %s3881_s13, 2  ;;  %p2944_p1 = scmp.eq.s32.totalorder %s2178_s30, 0 }
  0x25   : > { %p2465_p2 = pneg %p2940_p13  ;;  %s3832_s2 = sld [smem:[#allocation31_spill]] }
  0x26   : > { %s3883_s13 = smov (%p46_p0, %s3881_s13), 0 }
  0x27   : > { %3833 = sst [smem:[#allocation13_spill]] %s3883_s13  ;;  %p2466_p3 = pnand %p2944_p1, %p2465_p2 }
  0x29   : > { %p2775_p5 = pneg %p2466_p3 }
  0x2b   : > { %s355_s18 = sshll.u32 %s3832_s2, 4  ;;  %s356_s18 = int_to_ptr.vmem [resolvable:$true] %s355_s18 }
  0x2c   : > { %s2773_s19 = scalar_lea.vmem %s356_s18, 16  ;;  %p2781_p8 = scmp.lt.s32.totalorder %s356_s18, %s356_s18 }
  0x2d   : > { %p2774_p4 = scmp.ne.s32.totalorder %s356_s18, %s2773_s19  ;;  %p2782_p9 = scmp.lt.s32.totalorder %s2773_s19, %s2773_s19 }
  0x2f   : > { %p2776_p6 = pnand %p2775_p5, %p2774_p4  ;;  %p2783_p10 = por %p2782_p9, %p2781_p8 }
  0x31   : > { %p2777_p7 = pneg %p2776_p6 }
  0x33   : > { %p2784_p11 = pnand %p2783_p10, %p2777_p7 }
  0x35   : > { %2787 = shalt.err (!%p2784_p11)
}
  0x36   : > { %s2836_s20 = smov [#allocation8]   ;;  %468 = sbr.rel (%p2940_p13) target bundleno = 2184 (0x888), region = 56 }
  0x37   : > { %2468 = dma.vmem_to_smem (!%p2466_p3), %s356_s18, 16, %s2836_s20, [#allocation9]  }
  0x3d   : > { %2811 = dma.done.wait (%p2944_p1), [#allocation9], 16  }
  0x3e   : > { %2813 = vsyncadd (%p2944_p1), [#allocation9], 4294967280 }
  0x3f   : > { %474 = sfence }
  0x40   : > { %p551_p12 = scmp.lt.s32.totalorder %s2820_s26, 1  ;;  %s565_s21 = sshra.s32 %s2816_s1, 7 }
  0x41   : > { %s567_s22 = sadd.s32 %s2820_s26, %s565_s21  ;;  %s570_s23 = sand.u32 127, %s2816_s1 }
  0x42   : > { %s3885_s26 = smov (!%p551_p12, %s2820_s26), 1  ;;  %s2196_s24 = sshll.u32 %s567_s22, 7 }
  0x43   : > { %s632_s25 = sld [smem:[#allocation8]]  ;;  %s2191_s0 = sshll.u32 %s3885_s26, 1 }
  0x44   : > { %s2225_s30 = sshll.u32 %s3885_s26, 8  ;;  %s3834_s5 = sld [smem:[#allocation32_spill]] }
  0x45   : > { %s3835_s6 = sld [smem:[#allocation33_spill]]  ;;  %s3836_s7 = sld [smem:[#allocation34_spill]] }
  0x46   : > { %s2983_s13 = sadd.s32 %s2196_s24, %s570_s23  ;;  %s3837_s11 = sld [smem:[#allocation35_spill]] }
  0x47   : > { %s572_s22 = sld [smem:[#allocation6 + %s2983_s13]]  ;;  %p2206_p2 = scmp.ne.s32.totalorder %s2816_s1, 0 }
  0x48   : > { %s592_s12 = sld [smem:[#allocation6 + %s2983_s13]] }
  0x49   : > { %s613_s14 = sld [smem:[#allocation6 + %s2983_s13]] }
  0x4a   : > { %s2971_s15 = scalar_lea.vmem %s3834_s5, %s2191_s0  ;;  %s2204_s0 = sshll.u32 %s3885_s26, 3 }
  0x4b   : > { %s2976_s19 = scalar_lea.vmem %s3835_s6, %s2225_s30  ;;  %s2981_s21 = scalar_lea.vmem %s3836_s7, %s2225_s30 }
  0x4c   : > { %s2991_s17 = scalar_lea.vmem %s3837_s11, %s2204_s0  ;;  %s2993_s18 = sld [smem:[#allocation8 + $0x1]] }
  0x4d   : > { %p573_p13 = scmp.lt.s32.totalorder %s572_s22, 3 }
  0x4e   : > { %p593_p0 = scmp.lt.s32.totalorder %s592_s12, 3  ;;  %637 = sbr.rel (%p2206_p2) target bundleno = 478 (0x1de), region = 64 }
  0x4f   : > { %p614_p1 = scmp.lt.s32.totalorder %s613_s14, 3  ;;  %s3887_s22 = smov (!%p573_p13, %s572_s22), 3 }
  0x50   : > { %s3889_s12 = smov (!%p593_p0, %s592_s12), 3  ;;  %s2197_s2 = sshll.u32 %s3887_s22, 1 }
  0x51   : > { %s2998_s30 = scalar_lea.vmem %s3802_s8, %s2197_s2  ;;  %s2227_s20 = sshll.u32 %s3889_s12, 5 }
  0x52   : > { %s3003_s5 = scalar_lea.vmem %s3803_s9, %s2227_s20  ;;  %s3891_s14 = smov (!%p614_p1, %s613_s14), 3 }
  0x53   : > { %s2228_s0 = sshll.u32 %s3891_s14, 5 }
  0x54   : > { %s3008_s11 = scalar_lea.vmem %s3804_s10, %s2228_s0 }
  0x55   : > { %v647_v0 = vstv %s632_s25  ;;  %v665_v1 = vld [vmem:[%s2976_s19 + $0x10] sm:$0xff]  ;;  %v3017_v2 = vld [vmem:[%s3798_s4] ss:$0 sm:$0xff]  ;;  %v664_v5 = vld [vmem:[%s2976_s19 + $0x8] sm:$0xff]  ;;  %vm650_vm0 = vcmask 1041408   ;;  %vm1150_vm1 = vcmask 523264  }
  0x56   : > { %2518 = vrcp.f32 %v647_v0  ;;  %v663_v3 = vld [vmem:[%s2976_s19] sm:$0xff]  ;;  %v704_v6 = vsub.f32 %v665_v1, %v3017_v2  ;;  %v703_v9 = vsub.f32 %v664_v5, %v3017_v2  ;;  %v669_v10 = vld [vmem:[%s2976_s19 + $0x30] sm:$0xff]  ;;  %v666_v12 = vld [vmem:[%s2976_s19 + $0x18] sm:$0xff] }
  0x57   : > { %v667_v4 = vld [vmem:[%s2976_s19 + $0x20] sm:$0xff]  ;;  %v702_v7 = vsub.f32 %v663_v3, %v3017_v2  ;;  %v708_v17 = vsub.f32 %v669_v10, %v3017_v2  ;;  %v705_v20 = vsub.f32 %v666_v12, %v3017_v2  ;;  %v668_v21 = vld [vmem:[%s2976_s19 + $0x28] sm:$0xff]  ;;  %v694_v23 = vld [vmem:[%s2976_s19 + $0xf8] sm:$0xff] }
  0x58   : > { %v706_v8 = vsub.f32 %v667_v4, %v3017_v2  ;;  %v638_v15 = vld [vmem:[%s2971_s15] sm:$0x3]  ;;  %v707_v26 = vsub.f32 %v668_v21, %v3017_v2  ;;  %v670_v27 = vld [vmem:[%s2976_s19 + $0x38] sm:$0xff]  ;;  %v733_v30 = vsub.f32 %v694_v23, %v3017_v2  ;;  %v672_v34 = vld [vmem:[%s2976_s19 + $0x48] sm:$0xff] }
  0x59   : > { %v2207_v16 = vld [vmem:[%s3797_s3] ss:$0 sm:$0xff]  ;;  %v709_v31 = vsub.f32 %v670_v27, %v3017_v2  ;;  %v673_v37 = vld [vmem:[%s2976_s19 + $0x50] sm:$0xff]  ;;  %v711_v38 = vsub.f32 %v672_v34, %v3017_v2  ;;  %v674_v42 = vld [vmem:[%s2976_s19 + $0x58] sm:$0xff] }
  0x5a   : > { %v646_v22 = vsub.f32 %v638_v15, %v2207_v16  ;;  %v671_v29 = vld [vmem:[%s2976_s19 + $0x40] sm:$0xff]  ;;  %v712_v41 = vsub.f32 %v673_v37, %v3017_v2  ;;  %v713_v44 = vsub.f32 %v674_v42, %v3017_v2  ;;  %v676_v48 = vld [vmem:[%s2976_s19 + $0x68] sm:$0xff]  ;;  %v677_v49 = vld [vmem:[%s2976_s19 + $0x70] sm:$0xff] }
  0x5b   : > { %v710_v33 = vsub.f32 %v671_v29, %v3017_v2  ;;  %v675_v43 = vld [vmem:[%s2976_s19 + $0x60] sm:$0xff]  ;;  %v715_v50 = vsub.f32 %v676_v48, %v3017_v2  ;;  %v716_v53 = vsub.f32 %v677_v49, %v3017_v2  ;;  %v678_v54 = vld [vmem:[%s2976_s19 + $0x78] sm:$0xff]  ;;  %v680_v60 = vld [vmem:[%s2976_s19 + $0x88] sm:$0xff] }
  0x5c   : > { %v714_v47 = vsub.f32 %v675_v43, %v3017_v2  ;;  %v679_v55 = vld [vmem:[%s2976_s19 + $0x80] sm:$0xff]  ;;  %v717_v56 = vsub.f32 %v678_v54, %v3017_v2  ;;  %v681_v61 = vld [vmem:[%s2976_s19 + $0x90] sm:$0xff]  ;;  %v719_v62 = vsub.f32 %v680_v60, %v3017_v2  ;;  %v682_v3 = vld [vmem:[%s2976_s19 + $0x98] sm:$0xff] }
  0x5d   : > { %v718_v59 = vsub.f32 %v679_v55, %v3017_v2  ;;  %v720_v1 = vsub.f32 %v681_v61, %v3017_v2  ;;  %v683_v4 = vld [vmem:[%s2976_s19 + $0xa0] sm:$0xff]  ;;  %v721_v5 = vsub.f32 %v682_v3, %v3017_v2  ;;  %v685_v10 = vld [vmem:[%s2976_s19 + $0xb0] sm:$0xff]  ;;  %v688_v27 = vld [vmem:[%s2976_s19 + $0xc8] sm:$0xff] }
  0x5e   : > { %v687_v21 = vld [vmem:[%s2976_s19 + $0xc0] sm:$0xff]  ;;  %v693_v48 = vld [vmem:[%s2976_s19 + $0xf0] sm:$0xff]  ;;  %v3224_v61 = vld [vmem:[%s2981_s21 + $0x8] sm:$0xff] }
  0x5f   : > { %v726_v29 = vsub.f32 %v687_v21, %v3017_v2  ;;  %v732_v54 = vsub.f32 %v693_v48, %v3017_v2  ;;  %v3211_v55 = vld [vmem:[%s2981_s21] sm:$0xff]  ;;  %v3237_v3 = vld [vmem:[%s2981_s21 + $0x18] sm:$0xff] }
  0x60   : > { %v3027_v11 = vpop.eup %2518  ;;  %v1118_v60 = vmul.f32 %v3211_v55, %v3211_v55 }
  0x61   : > { %v3031_v13 = vmul.f32 %v3027_v11, %v704_v6  ;;  %v3034_v14 = vmul.f32 %v3027_v11, %v702_v7  ;;  %v3044_v18 = vmul.f32 %v3027_v11, %v706_v8  ;;  %v3047_v19 = vmul.f32 %v3027_v11, %v703_v9  ;;  %v684_v9 = vld [vmem:[%s2976_s19 + $0xa8] sm:$0xff] }
  0x62   : > { %v3055_v24 = vmul.f32 %v3027_v11, %v708_v17  ;;  %v3058_v25 = vmul.f32 %v3027_v11, %v705_v20  ;;  %v3063_v28 = vmul.f32 %v3027_v11, %v646_v22  ;;  %v3071_v32 = vmul.f32 %v3027_v11, %v707_v26  ;;  %v686_v17 = vld [vmem:[%s2976_s19 + $0xb8] sm:$0xff] }
  0x63   : > { %770 = vmax.xlane.f32.xlu0 %v3031_v13  ;;  %766 = vmax.xlane.f32.xlu1 %v3034_v14  ;;  %v3076_v35 = vmul.f32 %v3027_v11, %v733_v30  ;;  %v3084_v39 = vmul.f32 %v3027_v11, %v709_v31  ;;  %v3087_v40 = vmul.f32 %v3027_v11, %v710_v33  ;;  %v689_v30 = vld [vmem:[%s2976_s19 + $0xd0] sm:$0xff] }
  0x64   : > { %v651_v36 = vsel %vm650_vm0, %v3063_v28, -inf  ;;  %v3096_v45 = vmul.f32 %v3027_v11, %v711_v38  ;;  %v3099_v46 = vmul.f32 %v3027_v11, %v712_v41  ;;  %v3108_v51 = vmul.f32 %v3027_v11, %v713_v44  ;;  %v691_v38 = vld [vmem:[%s2976_s19 + $0xe0] sm:$0xff]  ;;  %v692_v44 = vld [vmem:[%s2976_s19 + $0xe8] sm:$0xff] }
  0x65   : > { %v3111_v52 = vmul.f32 %v3027_v11, %v714_v47  ;;  %v3120_v57 = vmul.f32 %v3027_v11, %v715_v50  ;;  %v3123_v58 = vmul.f32 %v3027_v11, %v716_v53  ;;  %v3132_v63 = vmul.f32 %v3027_v11, %v717_v56 }
  0x66   : > { %v3135_v0 = vmul.f32 %v3027_v11, %v718_v59  ;;  %v3144_v6 = vmul.f32 %v3027_v11, %v719_v62  ;;  %v3147_v7 = vmul.f32 %v3027_v11, %v720_v1  ;;  %v722_v8 = vsub.f32 %v683_v4, %v3017_v2  ;;  %v3240_v4 = vld [vmem:[%s2981_s21 + $0x20] sm:$0xff] }
  0x67   : > { %774 = vmax.xlane.f32.xlu0 %v3044_v18  ;;  %768 = vmax.xlane.f32.xlu1 %v3047_v19  ;;  %v723_v12 = vsub.f32 %v684_v9, %v3017_v2  ;;  %v3156_v15 = vmul.f32 %v3027_v11, %v721_v5  ;;  %v724_v20 = vsub.f32 %v685_v10, %v3017_v2 }
  0x68   : > { %v3159_v16 = vmul.f32 %v3027_v11, %v722_v8  ;;  %v725_v22 = vsub.f32 %v686_v17, %v3017_v2  ;;  %v727_v31 = vsub.f32 %v688_v27, %v3017_v2  ;;  %v3183_v34 = vmul.f32 %v3027_v11, %v726_v29  ;;  %v3253_v17 = vld [vmem:[%s2981_s21 + $0x30] sm:$0xff]  ;;  %v3262_v29 = vld [vmem:[%s2981_s21 + $0x38] sm:$0xff] }
  0x69   : > { %v3168_v23 = vmul.f32 %v3027_v11, %v723_v12  ;;  %v3171_v26 = vmul.f32 %v3027_v11, %v724_v20  ;;  %v728_v37 = vsub.f32 %v689_v30, %v3017_v2  ;;  %v730_v47 = vsub.f32 %v691_v38, %v3017_v2  ;;  %v3250_v12 = vld [vmem:[%s2981_s21 + $0x28] sm:$0xff]  ;;  %v3265_v30 = vld [vmem:[%s2981_s21 + $0x40] sm:$0xff] }
  0x6a   : > { %v3179_v33 = vmul.f32 %v3027_v11, %v725_v22  ;;  %v3191_v42 = vmul.f32 %v3027_v11, %v727_v31  ;;  %v731_v49 = vsub.f32 %v692_v44, %v3017_v2  ;;  %v3219_v59 = vmul.f32 %v3027_v11, %v732_v54  ;;  %v3277_v44 = vld [vmem:[%s2981_s21 + $0x50] sm:$0xff] }
  0x6b   : > { %778 = vmax.xlane.f32.xlu0 %v3055_v24  ;;  %772 = vmax.xlane.f32.xlu1 %v3058_v25  ;;  %v3195_v43 = vmul.f32 %v3027_v11, %v728_v37  ;;  %v3207_v53 = vmul.f32 %v3027_v11, %v730_v47  ;;  %v1119_v62 = vmul.f32 %v3224_v61, %v3224_v61 }
  0x6c   : > { %v3215_v56 = vmul.f32 %v3027_v11, %v731_v49  ;;  %v1121_v8 = vmul.f32 %v3237_v3, %v3237_v3  ;;  %v1122_v10 = vmul.f32 %v3240_v4, %v3240_v4  ;;  %v1123_v21 = vmul.f32 %v3250_v12, %v3250_v12 }
  0x6d   : > { %v1154_v5 = vsel %vm1150_vm1, %v1119_v62, 0.0  ;;  %v1124_v27 = vmul.f32 %v3253_v17, %v3253_v17  ;;  %v1126_v38 = vmul.f32 %v3265_v30, %v3265_v30  ;;  %v1128_v54 = vmul.f32 %v3277_v44, %v3277_v44  ;;  %v3289_v62 = vld [vmem:[%s2981_s21 + $0x60] sm:$0xff] }
  0x6e   : > { %v1160_v20 = vsel %vm1150_vm1, %v1121_v8, 0.0  ;;  %v1163_v22 = vsel %vm1150_vm1, %v1122_v10, 0.0  ;;  %v1166_v31 = vsel %vm1150_vm1, %v1123_v21, 0.0  ;;  %v1130_v8 = vmul.f32 %v3289_v62, %v3289_v62  ;;  %v3301_v10 = vld [vmem:[%s2981_s21 + $0x70] sm:$0xff] }
  0x6f   : > { %776 = vmax.xlane.f32.xlu1 %v3071_v32  ;;  %652 = vmax.xlane.f32.xlu0 %v651_v36  ;;  %v690_v36 = vld [vmem:[%s2976_s19 + $0xd8] sm:$0xff]  ;;  %v1169_v37 = vsel %vm1150_vm1, %v1124_v27, 0.0  ;;  %v1175_v49 = vsel %vm1150_vm1, %v1126_v38, 0.0  ;;  %v1132_v27 = vmul.f32 %v3301_v10, %v3301_v10 }
  0x70   : > { %v729_v41 = vsub.f32 %v690_v36, %v3017_v2  ;;  %v3227_v2 = vld [vmem:[%s2981_s21 + $0x10] sm:$0xff]  ;;  %v1125_v36 = vmul.f32 %v3262_v29, %v3262_v29 }
  0x71   : > { %v1120_v1 = vmul.f32 %v3227_v2, %v3227_v2 }
  0x72   : > { %v3203_v50 = vmul.f32 %v3027_v11, %v729_v41  ;;  %v1151_v11 = vsel %vm1150_vm1, %v1118_v60, 0.0  ;;  %v3274_v41 = vld [vmem:[%s2981_s21 + $0x48] sm:$0xff]  ;;  %v1172_v47 = vsel %vm1150_vm1, %v1125_v36, 0.0  ;;  %v3286_v60 = vld [vmem:[%s2981_s21 + $0x58] sm:$0xff]  ;;  %v3313_v36 = vld [vmem:[%s2981_s21 + $0x80] sm:$0xff] }
  0x73   : > { %780 = vmax.xlane.f32.xlu1 %v3084_v39  ;;  %782 = vmax.xlane.f32.xlu0 %v3087_v40  ;;  %v1157_v9 = vsel %vm1150_vm1, %v1120_v1, 0.0  ;;  %v1127_v48 = vmul.f32 %v3274_v41, %v3274_v41  ;;  %v1129_v1 = vmul.f32 %v3286_v60, %v3286_v60  ;;  %3838 = vst [vmem:[#allocation14_spill] sm:$0xff] %v3313_v36 }
  0x77   : > { %784 = vmax.xlane.f32.xlu1 %v3096_v45  ;;  %786 = vmax.xlane.f32.xlu0 %v3099_v46 }
  0x7b   : > { %788 = vmax.xlane.f32.xlu1 %v3108_v51  ;;  %790 = vmax.xlane.f32.xlu0 %v3111_v52 }
  0x7f   : > { %792 = vmax.xlane.f32.xlu1 %v3120_v57  ;;  %794 = vmax.xlane.f32.xlu0 %v3123_v58 }
  0x83   : > { %796 = vmax.xlane.f32.xlu1 %v3132_v63  ;;  %798 = vmax.xlane.f32.xlu0 %v3135_v0 }
  0x87   : > { %800 = vmax.xlane.f32.xlu1 %v3144_v6  ;;  %802 = vmax.xlane.f32.xlu0 %v3147_v7 }
  0x8b   : > { %804 = vmax.xlane.f32.xlu1 %v3156_v15  ;;  %806 = vmax.xlane.f32.xlu0 %v3159_v16 }
  0x8f   : > { %808 = vmax.xlane.f32.xlu1 %v3168_v23  ;;  %810 = vmax.xlane.f32.xlu0 %v3171_v26 }
  0x93   : > { %812 = vmax.xlane.f32.xlu1 %v3179_v33  ;;  %814 = vmax.xlane.f32.xlu0 %v3183_v34 }
  0x97   : > { %816 = vmax.xlane.f32.xlu1 %v3191_v42  ;;  %818 = vmax.xlane.f32.xlu0 %v3195_v43 }
  0x9b   : > { %820 = vmax.xlane.f32.xlu1 %v3203_v50  ;;  %822 = vmax.xlane.f32.xlu0 %v3207_v53 }
  0x9f   : > { %824 = vmax.xlane.f32.xlu1 %v3215_v56  ;;  %826 = vmax.xlane.f32.xlu0 %v3219_v59 }
  0xa3   : > { %828 = vmax.xlane.f32.xlu1 %v3076_v35  ;;  %1152 = vadd.xlane.f32.xlu0 %v1151_v11  ;;  %v1178_v11 = vsel %vm1150_vm1, %v1127_v48, 0.0  ;;  %v1134_v48 = vmul.f32 %v3313_v36, %v3313_v36 }
  0xa7   : > { %1155 = vadd.xlane.f32.xlu1 %v1154_v5  ;;  %1158 = vadd.xlane.f32.xlu0 %v1157_v9  ;;  %v1181_v5 = vsel %vm1150_vm1, %v1128_v54, 0.0  ;;  %v3298_v9 = vld [vmem:[%s2981_s21 + $0x68] sm:$0xff]  ;;  %v3325_v54 = vld [vmem:[%s2981_s21 + $0x90] sm:$0xff] }
  0xa8   : > { %v1131_v21 = vmul.f32 %v3298_v9, %v3298_v9  ;;  %3840 = vst [vmem:[#allocation16_spill] sm:$0xff] %v3325_v54 }
  0xab   : > { %1161 = vadd.xlane.f32.xlu1 %v1160_v20  ;;  %1164 = vadd.xlane.f32.xlu0 %v1163_v22  ;;  %v1184_v20 = vsel %vm1150_vm1, %v1129_v1, 0.0  ;;  %v1187_v22 = vsel %vm1150_vm1, %v1130_v8, 0.0  ;;  %v1136_v8 = vmul.f32 %v3325_v54, %v3325_v54 }
  0xaf   : > { %1167 = vadd.xlane.f32.xlu1 %v1166_v31  ;;  %1170 = vadd.xlane.f32.xlu0 %v1169_v37  ;;  %v3310_v31 = vld [vmem:[%s2981_s21 + $0x78] sm:$0xff]  ;;  %v1190_v37 = vsel %vm1150_vm1, %v1131_v21, 0.0  ;;  %v3337_v21 = vld [vmem:[%s2981_s21 + $0xa0] sm:$0xff] }
  0xb0   : > { %v1133_v38 = vmul.f32 %v3310_v31, %v3310_v31  ;;  %3842 = vst [vmem:[#allocation18_spill] sm:$0xff] %v3337_v21 }
  0xb3   : > { %1173 = vadd.xlane.f32.xlu1 %v1172_v47  ;;  %1176 = vadd.xlane.f32.xlu0 %v1175_v49  ;;  %v1193_v47 = vsel %vm1150_vm1, %v1132_v27, 0.0  ;;  %v3322_v49 = vld [vmem:[%s2981_s21 + $0x88] sm:$0xff] }
  0xb4   : > { %3839 = vst [vmem:[#allocation15_spill] sm:$0xff] %v3322_v49  ;;  %v1135_v1 = vmul.f32 %v3322_v49, %v3322_v49 }
  0xb7   : > { %1179 = vadd.xlane.f32.xlu1 %v1178_v11  ;;  %1182 = vadd.xlane.f32.xlu0 %v1181_v5  ;;  %v1196_v11 = vsel %vm1150_vm1, %v1133_v38, 0.0  ;;  %v1199_v5 = vsel %vm1150_vm1, %v1134_v48, 0.0  ;;  %v1138_v38 = vmul.f32 %v3337_v21, %v3337_v21  ;;  %v3349_v48 = vld [vmem:[%s2981_s21 + $0xb0] sm:$0xff]  ;;  %v3361_v21 = vld [vmem:[%s2981_s21 + $0xc0] sm:$0xff] }
  0xb8   : > { %3844 = vst [vmem:[#allocation20_spill] sm:$0xff] %v3349_v48  ;;  %3846 = vst [vmem:[#allocation22_spill] sm:$0xff] %v3361_v21 }
  0xbb   : > { %1185 = vadd.xlane.f32.xlu1 %v1184_v20  ;;  %1188 = vadd.xlane.f32.xlu0 %v1187_v22  ;;  %v3334_v20 = vld [vmem:[%s2981_s21 + $0x98] sm:$0xff]  ;;  %v1202_v22 = vsel %vm1150_vm1, %v1135_v1, 0.0 }
  0xbc   : > { %3841 = vst [vmem:[#allocation17_spill] sm:$0xff] %v3334_v20  ;;  %v1137_v27 = vmul.f32 %v3334_v20, %v3334_v20  ;;  %v3358_v20 = vld [vmem:[%s2981_s21 + $0xb8] sm:$0xff] }
  0xbd   : > { %3845 = vst [vmem:[#allocation21_spill] sm:$0xff] %v3358_v20 }
  0xbf   : > { %1191 = vadd.xlane.f32.xlu1 %v1190_v37  ;;  %1194 = vadd.xlane.f32.xlu0 %v1193_v47  ;;  %v1205_v37 = vsel %vm1150_vm1, %v1136_v8, 0.0  ;;  %v3346_v47 = vld [vmem:[%s2981_s21 + $0xa8] sm:$0xff]  ;;  %v1140_v8 = vmul.f32 %v3349_v48, %v3349_v48  ;;  %v3373_v48 = vld [vmem:[%s2981_s21 + $0xd0] sm:$0xff] }
  0xc0   : > { %3843 = vst [vmem:[#allocation19_spill] sm:$0xff] %v3346_v47  ;;  %v1139_v1 = vmul.f32 %v3346_v47, %v3346_v47  ;;  %v3370_v47 = vld [vmem:[%s2981_s21 + $0xc8] sm:$0xff]  ;;  %3848 = vst [vmem:[#allocation24_spill] sm:$0xff] %v3373_v48 }
  0xc1   : > { %3847 = vst [vmem:[#allocation23_spill] sm:$0xff] %v3370_v47 }
  0xc3   : > { %1197 = vadd.xlane.f32.xlu1 %v1196_v11  ;;  %1200 = vadd.xlane.f32.xlu0 %v1199_v5  ;;  %v1208_v11 = vsel %vm1150_vm1, %v1137_v27, 0.0  ;;  %v1211_v5 = vsel %vm1150_vm1, %v1138_v38, 0.0  ;;  %v1141_v27 = vmul.f32 %v3358_v20, %v3358_v20  ;;  %v1142_v38 = vmul.f32 %v3361_v21, %v3361_v21  ;;  %v3382_v20 = vld [vmem:[%s2981_s21 + $0xd8] sm:$0xff]  ;;  %v3385_v21 = vld [vmem:[%s2981_s21 + $0xe0] sm:$0xff] }
  0xc4   : > { %3849 = vst [vmem:[#allocation25_spill] sm:$0xff] %v3382_v20  ;;  %3850 = vst [vmem:[#allocation26_spill] sm:$0xff] %v3385_v21 }
  0xc7   : > { %1203 = vadd.xlane.f32.xlu1 %v1202_v22  ;;  %1206 = vadd.xlane.f32.xlu0 %v1205_v37  ;;  %v1214_v22 = vsel %vm1150_vm1, %v1139_v1, 0.0  ;;  %v1217_v37 = vsel %vm1150_vm1, %v1140_v8, 0.0  ;;  %v1143_v1 = vmul.f32 %v3370_v47, %v3370_v47  ;;  %v1144_v8 = vmul.f32 %v3373_v48, %v3373_v48  ;;  %v3394_v47 = vld [vmem:[%s2981_s21 + $0xe8] sm:$0xff]  ;;  %v3397_v48 = vld [vmem:[%s2981_s21 + $0xf0] sm:$0xff] }
  0xc8   : > { %3851 = vst [vmem:[#allocation27_spill] sm:$0xff] %v3394_v47  ;;  %3852 = vst [vmem:[#allocation28_spill] sm:$0xff] %v3397_v48 }
  0xcb   : > { %1209 = vadd.xlane.f32.xlu1 %v1208_v11  ;;  %1212 = vadd.xlane.f32.xlu0 %v1211_v5  ;;  %v1220_v11 = vsel %vm1150_vm1, %v1141_v27, 0.0  ;;  %v1223_v5 = vsel %vm1150_vm1, %v1142_v38, 0.0  ;;  %v1145_v27 = vmul.f32 %v3382_v20, %v3382_v20  ;;  %v1146_v38 = vmul.f32 %v3385_v21, %v3385_v21 }
  0xcd   : > { %v1232_v54 = vsel %vm1150_vm1, %v1145_v27, 0.0 }
  0xcf   : > { %1215 = vadd.xlane.f32.xlu1 %v1214_v22  ;;  %1218 = vadd.xlane.f32.xlu0 %v1217_v37  ;;  %v1226_v22 = vsel %vm1150_vm1, %v1143_v1, 0.0  ;;  %v1229_v37 = vsel %vm1150_vm1, %v1144_v8, 0.0  ;;  %v1235_v1 = vsel %vm1150_vm1, %v1146_v38, 0.0  ;;  %v3406_v8 = vld [vmem:[%s2981_s21 + $0xf8] sm:$0xff] }
  0xd0   : > { %3853 = vst [vmem:[#allocation29_spill] sm:$0xff] %v3406_v8 }
  0xd3   : > { %1221 = vadd.xlane.f32.xlu1 %v1220_v11  ;;  %1224 = vadd.xlane.f32.xlu0 %v1223_v5  ;;  %v1147_v11 = vmul.f32 %v3394_v47, %v3394_v47  ;;  %v1148_v5 = vmul.f32 %v3397_v48, %v3397_v48 }
  0xd5   : > { %v1238_v21 = vsel %vm1150_vm1, %v1147_v11, 0.0 }
  0xd7   : > { %1227 = vadd.xlane.f32.xlu1 %v1226_v22  ;;  %1230 = vadd.xlane.f32.xlu0 %v1229_v37  ;;  %v1149_v22 = vmul.f32 %v3406_v8, %v3406_v8  ;;  %v1241_v37 = vsel %vm1150_vm1, %v1148_v5, 0.0 }
  0xd9   : > { %v1244_v27 = vsel %vm1150_vm1, %v1149_v22, 0.0 }
  0xdb   : > { %1233 = vadd.xlane.f32.xlu1 %v1232_v54  ;;  %1236 = vadd.xlane.f32.xlu0 %v1235_v1 }
  0xdf   : > { %1239 = vadd.xlane.f32.xlu1 %v1238_v21  ;;  %1242 = vadd.xlane.f32.xlu0 %v1241_v37 }
  0xe3   : > { %1245 = vadd.xlane.f32.xlu1 %v1244_v27 }
  0xf0   : > { %v771_v38 = vpop.xlane.xlu0 %770  ;;  %v767_v47 = vpop.xlane.xlu1 %766 }
  0xf1   : > { %v832_v48 = vsub.f32 %v3031_v13, %v771_v38  ;;  %v830_v20 = vsub.f32 %v3034_v14, %v767_v47 }
  0xf3   : > { %v862_v54 = vmul.f32 1.442695, %v830_v20  ;;  %v866_v11 = vmul.f32 1.442695, %v832_v48 }
  0xf4   : > { %v775_v1 = vpop.xlane.xlu0 %774  ;;  %v769_v49 = vpop.xlane.xlu1 %768 }
  0xf5   : > { %v834_v36 = vsub.f32 %v3044_v18, %v775_v1  ;;  %v831_v8 = vsub.f32 %v3047_v19, %v769_v49  ;;  %2520 = vpow2.f32 %v862_v54 }
  0xf6   : > { %2522 = vpow2.f32 %v866_v11 }
  0xf7   : > { %v864_v21 = vmul.f32 1.442695, %v831_v8  ;;  %v870_v22 = vmul.f32 1.442695, %v834_v36 }
  0xf8   : > { %v779_v5 = vpop.xlane.xlu0 %778  ;;  %v773_v37 = vpop.xlane.xlu1 %772 }
  0xf9   : > { %v833_v27 = vsub.f32 %v3058_v25, %v773_v37  ;;  %2524 = vpow2.f32 %v864_v21  ;;  %v836_v13 = vsub.f32 %v3055_v24, %v779_v5 }
  0xfa   : > { %2526 = vpow2.f32 %v870_v22 }
  0xfb   : > { %v868_v14 = vmul.f32 1.442695, %v833_v27  ;;  %v874_v48 = vmul.f32 1.442695, %v836_v13 }
  0xfc   : > { %v777_v20 = vpop.xlane.xlu1 %776  ;;  %v3419_v47 = vpop.xlane.xlu0 %652 }
  0xfd   : > { %v835_v18 = vsub.f32 %v3071_v32, %v777_v20  ;;  %2528 = vpow2.f32 %v868_v14 }
  0xff   : > { %v872_v19 = vmul.f32 1.442695, %v835_v18  ;;  %v3422_v49 = vpop.eup %2520 }
 0x100   : > { %v781_v8 = vpop.xlane.xlu1 %780  ;;  %v783_v38 = vpop.xlane.xlu0 %782  ;;  %926 = vadd.xlane.f32.xlu0 %v3422_v49 }
 0x101   : > { %2530 = vpow2.f32 %v872_v19  ;;  %v837_v25 = vsub.f32 %v3084_v39, %v781_v8  ;;  %v838_v24 = vsub.f32 %v3087_v40, %v783_v38  ;;  %v3427_v36 = vpop.eup %2522 }
 0x102   : > { %2532 = vpow2.f32 %v874_v48 }
 0x103   : > { %v876_v54 = vmul.f32 1.442695, %v837_v25  ;;  %v878_v1 = vmul.f32 1.442695, %v838_v24  ;;  %v3429_v32 = vpop.eup %2524 }
 0x104   : > { %v785_v11 = vpop.xlane.xlu1 %784  ;;  %v787_v21 = vpop.xlane.xlu0 %786  ;;  %928 = vadd.xlane.f32.xlu1 %v3429_v32  ;;  %930 = vadd.xlane.f32.xlu0 %v3427_v36 }
 0x105   : > { %2534 = vpow2.f32 %v876_v54  ;;  %v839_v5 = vsub.f32 %v3096_v45, %v785_v11  ;;  %v840_v39 = vsub.f32 %v3099_v46, %v787_v21  ;;  %v3435_v40 = vpop.eup %2526 }
 0x106   : > { %2536 = vpow2.f32 %v878_v1 }
 0x107   : > { %v880_v37 = vmul.f32 1.442695, %v839_v5  ;;  %v882_v22 = vmul.f32 1.442695, %v840_v39  ;;  %v3437_v27 = vpop.eup %2528 }
 0x108   : > { %v789_v13 = vpop.xlane.xlu1 %788  ;;  %v791_v14 = vpop.xlane.xlu0 %790  ;;  %932 = vadd.xlane.f32.xlu1 %v3437_v27  ;;  %934 = vadd.xlane.f32.xlu0 %v3435_v40 }
 0x109   : > { %2538 = vpow2.f32 %v880_v37  ;;  %v841_v20 = vsub.f32 %v3108_v51, %v789_v13  ;;  %v842_v45 = vsub.f32 %v3111_v52, %v791_v14 }
 0x10a   : > { %2540 = vpow2.f32 %v882_v22 }
 0x10b   : > { %v3443_v46 = vpop.eup %2530  ;;  %v884_v18 = vmul.f32 1.442695, %v841_v20  ;;  %v886_v48 = vmul.f32 1.442695, %v842_v45  ;;  %v654_v45 = vsub.f32 %v3063_v28, %v3419_v47 }
 0x10c   : > { %v3445_v19 = vpop.eup %2532  ;;  %v793_v8 = vpop.xlane.xlu1 %792  ;;  %936 = vadd.xlane.f32.xlu1 %v3443_v46 }
 0x10d   : > { %v795_v38 = vpop.xlane.xlu0 %794  ;;  %2542 = vpow2.f32 %v884_v18  ;;  %v843_v25 = vsub.f32 %v3120_v57, %v793_v8  ;;  %938 = vadd.xlane.f32.xlu0 %v3445_v19 }
 0x10e   : > { %v844_v51 = vsub.f32 %v3123_v58, %v795_v38  ;;  %2544 = vpow2.f32 %v886_v48 }
 0x10f   : > { %v3451_v52 = vpop.eup %2534  ;;  %v888_v24 = vmul.f32 1.442695, %v843_v25 }
 0x110   : > { %v890_v54 = vmul.f32 1.442695, %v844_v51  ;;  %v3453_v1 = vpop.eup %2536  ;;  %v797_v11 = vpop.xlane.xlu1 %796  ;;  %940 = vadd.xlane.f32.xlu1 %v3451_v52 }
 0x111   : > { %v799_v21 = vpop.xlane.xlu0 %798  ;;  %2546 = vpow2.f32 %v888_v24  ;;  %v845_v5 = vsub.f32 %v3132_v63, %v797_v11  ;;  %942 = vadd.xlane.f32.xlu0 %v3453_v1  ;;  %v655_v24 = vmul.f32 1.442695, %v654_v45 }
 0x112   : > { %v846_v57 = vsub.f32 %v3135_v0, %v799_v21  ;;  %2548 = vpow2.f32 %v890_v54 }
 0x113   : > { %v3459_v58 = vpop.eup %2538  ;;  %v892_v39 = vmul.f32 1.442695, %v845_v5 }
 0x114   : > { %v894_v37 = vmul.f32 1.442695, %v846_v57  ;;  %v3461_v22 = vpop.eup %2540  ;;  %v801_v13 = vpop.xlane.xlu1 %800  ;;  %944 = vadd.xlane.f32.xlu1 %v3459_v58 }
 0x115   : > { %v803_v14 = vpop.xlane.xlu0 %802  ;;  %2550 = vpow2.f32 %v892_v39  ;;  %v847_v20 = vsub.f32 %v3144_v6, %v801_v13  ;;  %946 = vadd.xlane.f32.xlu0 %v3461_v22 }
 0x116   : > { %v848_v63 = vsub.f32 %v3147_v7, %v803_v14  ;;  %2552 = vpow2.f32 %v894_v37 }
 0x117   : > { %v3467_v0 = vpop.eup %2542  ;;  %v896_v18 = vmul.f32 1.442695, %v847_v20 }
 0x118   : > { %v898_v48 = vmul.f32 1.442695, %v848_v63  ;;  %v3471_v8 = vpop.eup %2544  ;;  %v805_v38 = vpop.xlane.xlu1 %804  ;;  %948 = vadd.xlane.f32.xlu1 %v3467_v0 }
 0x119   : > { %v807_v25 = vpop.xlane.xlu0 %806  ;;  %2554 = vpow2.f32 %v896_v18  ;;  %v849_v6 = vsub.f32 %v3156_v15, %v805_v38  ;;  %950 = vadd.xlane.f32.xlu0 %v3471_v8 }
 0x11a   : > { %v850_v7 = vsub.f32 %v3159_v16, %v807_v25  ;;  %2556 = vpow2.f32 %v898_v48 }
 0x11b   : > { %v3477_v51 = vpop.eup %2546  ;;  %v900_v28 = vmul.f32 1.442695, %v849_v6 }
 0x11c   : > { %v902_v47 = vmul.f32 1.442695, %v850_v7  ;;  %v3479_v54 = vpop.eup %2548  ;;  %v809_v11 = vpop.xlane.xlu1 %808  ;;  %952 = vadd.xlane.f32.xlu1 %v3477_v51 }
 0x11d   : > { %v811_v21 = vpop.xlane.xlu0 %810  ;;  %2558 = vpow2.f32 %v900_v28  ;;  %v851_v5 = vsub.f32 %v3168_v23, %v809_v11  ;;  %954 = vadd.xlane.f32.xlu0 %v3479_v54 }
 0x11e   : > { %v852_v15 = vsub.f32 %v3171_v26, %v811_v21  ;;  %2560 = vpow2.f32 %v902_v47 }
 0x11f   : > { %v3485_v16 = vpop.eup %2550  ;;  %2562 = vpow2.f32 %v655_v24  ;;  %v904_v57 = vmul.f32 1.442695, %v851_v5 }
 0x120   : > { %v3487_v39 = vpop.eup %2552  ;;  %v813_v37 = vpop.xlane.xlu1 %812  ;;  %v906_v13 = vmul.f32 1.442695, %v852_v15  ;;  %956 = vadd.xlane.f32.xlu1 %v3485_v16 }
 0x121   : > { %v815_v14 = vpop.xlane.xlu0 %814  ;;  %2564 = vpow2.f32 %v904_v57  ;;  %v853_v20 = vsub.f32 %v3179_v33, %v813_v37  ;;  %958 = vadd.xlane.f32.xlu0 %v3487_v39 }
 0x122   : > { %v854_v23 = vsub.f32 %v3183_v34, %v815_v14  ;;  %2566 = vpow2.f32 %v906_v13 }
 0x123   : > { %v3493_v26 = vpop.eup %2554  ;;  %v908_v63 = vmul.f32 1.442695, %v853_v20 }
 0x124   : > { %v3495_v45 = vpop.eup %2556  ;;  %v817_v18 = vpop.xlane.xlu1 %816  ;;  %v910_v48 = vmul.f32 1.442695, %v854_v23  ;;  %960 = vadd.xlane.f32.xlu1 %v3493_v26 }
 0x125   : > { %v819_v38 = vpop.xlane.xlu0 %818  ;;  %2568 = vpow2.f32 %v908_v63  ;;  %v855_v25 = vsub.f32 %v3191_v42, %v817_v18  ;;  %962 = vadd.xlane.f32.xlu0 %v3495_v45 }
 0x126   : > { %v856_v33 = vsub.f32 %v3195_v43, %v819_v38  ;;  %2570 = vpow2.f32 %v910_v48 }
 0x127   : > { %v3501_v6 = vpop.eup %2558  ;;  %v912_v34 = vmul.f32 1.442695, %v855_v25 }
 0x128   : > { %v3503_v7 = vpop.eup %2560  ;;  %v821_v24 = vpop.xlane.xlu1 %820  ;;  %v914_v28 = vmul.f32 1.442695, %v856_v33  ;;  %964 = vadd.xlane.f32.xlu1 %v3501_v6 }
 0x129   : > { %v823_v47 = vpop.xlane.xlu0 %822  ;;  %v3505_v11 = vpop.eup %2562  ;;  %2572 = vpow2.f32 %v912_v34  ;;  %v857_v42 = vsub.f32 %v3203_v50, %v821_v24  ;;  %966 = vadd.xlane.f32.xlu0 %v3503_v7 }
 0x12a   : > { %v858_v43 = vsub.f32 %v3207_v53, %v823_v47  ;;  %2574 = vpow2.f32 %v914_v28  ;;  %v657_v57 = vsel %vm650_vm0, %v3505_v11, 0.0 }
 0x12b   : > { %v3511_v21 = vpop.eup %2564  ;;  %v916_v5 = vmul.f32 1.442695, %v857_v42 }
 0x12c   : > { %v825_v15 = vpop.xlane.xlu1 %824  ;;  %v918_v37 = vmul.f32 1.442695, %v858_v43  ;;  %968 = vadd.xlane.f32.xlu1 %v3511_v21  ;;  %v3518_v20 = vpop.eup %2566 }
 0x12d   : > { %v827_v13 = vpop.xlane.xlu0 %826  ;;  %2576 = vpow2.f32 %v916_v5  ;;  %v859_v14 = vsub.f32 %v3215_v56, %v825_v15  ;;  %658 = vadd.xlane.f32.xlu0 %v657_v57 }
 0x12e   : > { %v860_v50 = vsub.f32 %v3219_v59, %v827_v13  ;;  %2578 = vpow2.f32 %v918_v37 }
 0x12f   : > { %v3520_v53 = vpop.eup %2568  ;;  %v920_v23 = vmul.f32 1.442695, %v859_v14 }
 0x130   : > { %v829_v63 = vpop.xlane.xlu1 %828  ;;  %v922_v18 = vmul.f32 1.442695, %v860_v50  ;;  %972 = vadd.xlane.f32.xlu1 %v3520_v53  ;;  %v3525_v25 = vpop.eup %2570 }
 0x131   : > { %v1153_v48 = vpop.xlane.xlu0 %1152  ;;  %2580 = vpow2.f32 %v920_v23  ;;  %v861_v38 = vsub.f32 %v3076_v35, %v829_v63  ;;  %970 = vadd.xlane.f32.xlu0 %v3518_v20 }
 0x132   : > { %v1247_v56 = vmax.f32 %v1153_v48, 1e-24 }
 0x133   : > { %v3527_v59 = vpop.eup %2572  ;;  %v924_v33 = vmul.f32 1.442695, %v861_v38 }
 0x134   : > { %2582 = vrsqrt.f32 %v1247_v56  ;;  %v1156_v34 = vpop.xlane.xlu1 %1155  ;;  %976 = vadd.xlane.f32.xlu1 %v3527_v59  ;;  %v3531_v35 = vpop.eup %2574 }
 0x135   : > { %2584 = vpow2.f32 %v922_v18  ;;  %v1159_v24 = vpop.xlane.xlu0 %1158  ;;  %974 = vadd.xlane.f32.xlu0 %v3525_v25  ;;  %v1248_v28 = vmax.f32 %v1156_v34, 1e-24 }
 0x136   : > { %2586 = vpow2.f32 %v924_v33  ;;  %v1249_v47 = vmax.f32 %v1159_v24, 1e-24 }
 0x137   : > { %v3533_v42 = vpop.eup %2576  ;;  %2588 = vrsqrt.f32 %v1248_v28 }
 0x138   : > { %v1162_v43 = vpop.xlane.xlu1 %1161  ;;  %2590 = vrsqrt.f32 %v1249_v47  ;;  %980 = vadd.xlane.f32.xlu1 %v3533_v42  ;;  %v3537_v37 = vpop.eup %2578 }
 0x139   : > { %v1165_v5 = vpop.xlane.xlu0 %1164  ;;  %978 = vadd.xlane.f32.xlu0 %v3531_v35  ;;  %v1250_v15 = vmax.f32 %v1162_v43, 1e-24 }
 0x13a   : > { %v1251_v57 = vmax.f32 %v1165_v5, 1e-24 }
 0x13b   : > { %v3539_v13 = vpop.eup %2580  ;;  %2592 = vrsqrt.f32 %v1250_v15 }
 0x13c   : > { %v1168_v14 = vpop.xlane.xlu1 %1167  ;;  %2594 = vrsqrt.f32 %v1251_v57  ;;  %984 = vadd.xlane.f32.xlu1 %v3539_v13 }
 0x13d   : > { %v1171_v50 = vpop.xlane.xlu0 %1170  ;;  %982 = vadd.xlane.f32.xlu0 %v3537_v37  ;;  %v1252_v63 = vmax.f32 %v1168_v14, 1e-24 }
 0x13e   : > { %v2583_v23 = vpop.eup %2582  ;;  %v1253_v18 = vmax.f32 %v1171_v50, 1e-24 }
 0x13f   : > { %v3543_v48 = vpop.eup %2584  ;;  %2596 = vrsqrt.f32 %v1252_v63  ;;  %v1311_v56 = vmul.f32 %v2583_v23, %v3211_v55 }
 0x140   : > { %3854 = vst [vmem:[#allocation30_spill] sm:$0xff] %v3543_v48  ;;  %v3545_v38 = vpop.eup %2586  ;;  %v1174_v33 = vpop.xlane.xlu1 %1173  ;;  %2598 = vrsqrt.f32 %v1253_v18 }
 0x141   : > { %v1177_v34 = vpop.xlane.xlu0 %1176  ;;  %v2589_v24 = vpop.eup %2588  ;;  %988 = vadd.xlane.f32.xlu1 %v3545_v38  ;;  %986 = vadd.xlane.f32.xlu0 %v3543_v48  ;;  %v1254_v28 = vmax.f32 %v1174_v33, 1e-24 }
 0x142   : > { %v1255_v47 = vmax.f32 %v1177_v34, 1e-24  ;;  %v2591_v43 = vpop.eup %2590  ;;  %v1312_v5 = vmul.f32 %v2589_v24, %v3224_v61 }
 0x143   : > { %2600 = vrsqrt.f32 %v1254_v28  ;;  %v1313_v57 = vmul.f32 %v2591_v43, %v3227_v2 }
 0x144   : > { %v1343_v15 = vpack.c.bf16 %v1312_v5, %v1311_v56  ;;  %v1180_v14 = vpop.xlane.xlu1 %1179  ;;  %2602 = vrsqrt.f32 %v1255_v47 }
 0x145   : > { %v1183_v55 = vpop.xlane.xlu0 %1182  ;;  %v2593_v50 = vpop.eup %2592  ;;  %v1256_v23 = vmax.f32 %v1180_v14, 1e-24 }
 0x146   : > { %v1257_v63 = vmax.f32 %v1183_v55, 1e-24  ;;  %v2595_v18 = vpop.eup %2594  ;;  %1359 = vst.msk [vmem:[#allocation4] sm:$0xff] %vm1150_vm1, %v1343_v15  ;;  %v1314_v48 = vmul.f32 %v2593_v50, %v3237_v3 }
 0x147   : > { %2604 = vrsqrt.f32 %v1256_v23  ;;  %v1315_v34 = vmul.f32 %v2595_v18, %v3240_v4 }
 0x148   : > { %v1344_v33 = vpack.c.bf16 %v1314_v48, %v1313_v57  ;;  %v1186_v61 = vpop.xlane.xlu1 %1185  ;;  %2606 = vrsqrt.f32 %v1257_v63 }
 0x149   : > { %v1189_v56 = vpop.xlane.xlu0 %1188  ;;  %v2597_v24 = vpop.eup %2596  ;;  %v1258_v2 = vmax.f32 %v1186_v61, 1e-24 }
 0x14a   : > { %v1259_v28 = vmax.f32 %v1189_v56, 1e-24  ;;  %v2599_v47 = vpop.eup %2598  ;;  %1360 = vst.msk [vmem:[#allocation4 + $0x8] sm:$0xff] %vm1150_vm1, %v1344_v33  ;;  %v1316_v43 = vmul.f32 %v2597_v24, %v3250_v12 }
 0x14b   : > { %2608 = vrsqrt.f32 %v1258_v2  ;;  %v1317_v15 = vmul.f32 %v2599_v47, %v3253_v17 }
 0x14c   : > { %v1345_v5 = vpack.c.bf16 %v1316_v43, %v1315_v34  ;;  %v1192_v3 = vpop.xlane.xlu1 %1191  ;;  %2610 = vrsqrt.f32 %v1259_v28 }
 0x14d   : > { %v1195_v48 = vpop.xlane.xlu0 %1194  ;;  %v2601_v57 = vpop.eup %2600  ;;  %v1260_v4 = vmax.f32 %v1192_v3, 1e-24 }
 0x14e   : > { %v1261_v14 = vmax.f32 %v1195_v48, 1e-24  ;;  %v2603_v55 = vpop.eup %2602  ;;  %1361 = vst.msk [vmem:[#allocation4 + $0x10] sm:$0xff] %vm1150_vm1, %v1345_v5  ;;  %v1318_v50 = vmul.f32 %v2601_v57, %v3262_v29 }
 0x14f   : > { %2612 = vrsqrt.f32 %v1260_v4  ;;  %v1319_v63 = vmul.f32 %v2603_v55, %v3265_v30 }
 0x150   : > { %v1346_v23 = vpack.c.bf16 %v1318_v50, %v1317_v15  ;;  %v1198_v12 = vpop.xlane.xlu1 %1197  ;;  %2614 = vrsqrt.f32 %v1261_v14 }
 0x151   : > { %v1201_v18 = vpop.xlane.xlu0 %1200  ;;  %v2605_v33 = vpop.eup %2604  ;;  %v1262_v17 = vmax.f32 %v1198_v12, 1e-24 }
 0x152   : > { %v1263_v34 = vmax.f32 %v1201_v18, 1e-24  ;;  %v2607_v61 = vpop.eup %2606  ;;  %1362 = vst.msk [vmem:[#allocation4 + $0x18] sm:$0xff] %vm1150_vm1, %v1346_v23  ;;  %v1320_v56 = vmul.f32 %v2605_v33, %v3274_v41 }
 0x153   : > { %2616 = vrsqrt.f32 %v1262_v17  ;;  %v1321_v2 = vmul.f32 %v2607_v61, %v3277_v44 }
 0x154   : > { %v1347_v24 = vpack.c.bf16 %v1320_v56, %v1319_v63  ;;  %v1204_v29 = vpop.xlane.xlu1 %1203  ;;  %2618 = vrsqrt.f32 %v1263_v34  ;;  %v3855_v56 = vld [vmem:[#allocation14_spill] sm:$0xff] }
 0x155   : > { %v1207_v28 = vpop.xlane.xlu0 %1206  ;;  %v2609_v47 = vpop.eup %2608  ;;  %v1264_v30 = vmax.f32 %v1204_v29, 1e-24 }
 0x156   : > { %v1265_v43 = vmax.f32 %v1207_v28, 1e-24  ;;  %v2611_v5 = vpop.eup %2610  ;;  %1363 = vst.msk [vmem:[#allocation4 + $0x20] sm:$0xff] %vm1150_vm1, %v1347_v24  ;;  %v1322_v15 = vmul.f32 %v2609_v47, %v3286_v60 }
 0x157   : > { %2620 = vrsqrt.f32 %v1264_v30  ;;  %v1323_v48 = vmul.f32 %v2611_v5, %v3289_v62  ;;  %v3856_v30 = vld [vmem:[#allocation15_spill] sm:$0xff] }
 0x158   : > { %v1348_v3 = vpack.c.bf16 %v1322_v15, %v1321_v2  ;;  %v1210_v41 = vpop.xlane.xlu1 %1209  ;;  %2622 = vrsqrt.f32 %v1265_v43  ;;  %v3857_v15 = vld [vmem:[#allocation16_spill] sm:$0xff] }
 0x159   : > { %v1213_v57 = vpop.xlane.xlu0 %1212  ;;  %v2613_v4 = vpop.eup %2612  ;;  %v1266_v44 = vmax.f32 %v1210_v41, 1e-24 }
 0x15a   : > { %v1267_v14 = vmax.f32 %v1213_v57, 1e-24  ;;  %v2615_v55 = vpop.eup %2614  ;;  %1364 = vst.msk [vmem:[#allocation4 + $0x28] sm:$0xff] %vm1150_vm1, %v1348_v3  ;;  %v1324_v50 = vmul.f32 %v2613_v4, %v3298_v9 }
 0x15b   : > { %2624 = vrsqrt.f32 %v1266_v44  ;;  %v1325_v63 = vmul.f32 %v2615_v55, %v3301_v10 }
 0x15c   : > { %v1349_v23 = vpack.c.bf16 %v1324_v50, %v1323_v48  ;;  %v1216_v60 = vpop.xlane.xlu1 %1215  ;;  %2626 = vrsqrt.f32 %v1267_v14  ;;  %v3858_v14 = vld [vmem:[#allocation17_spill] sm:$0xff] }
 0x15d   : > { %v1219_v12 = vpop.xlane.xlu0 %1218  ;;  %v2617_v18 = vpop.eup %2616  ;;  %v1268_v62 = vmax.f32 %v1216_v60, 1e-24 }
 0x15e   : > { %v1269_v33 = vmax.f32 %v1219_v12, 1e-24  ;;  %v2619_v17 = vpop.eup %2618  ;;  %1365 = vst.msk [vmem:[#allocation4 + $0x30] sm:$0xff] %vm1150_vm1, %v1349_v23  ;;  %v1326_v34 = vmul.f32 %v2617_v18, %v3310_v31  ;;  %v3859_v23 = vld [vmem:[#allocation18_spill] sm:$0xff] }
 0x15f   : > { %2628 = vrsqrt.f32 %v1268_v62  ;;  %v1327_v24 = vmul.f32 %v2619_v17, %v3855_v56 }
 0x160   : > { %v1350_v61 = vpack.c.bf16 %v1326_v34, %v1325_v63  ;;  %v1222_v9 = vpop.xlane.xlu1 %1221  ;;  %2630 = vrsqrt.f32 %v1269_v33  ;;  %v3860_v34 = vld [vmem:[#allocation19_spill] sm:$0xff] }
 0x161   : > { %v1225_v2 = vpop.xlane.xlu0 %1224  ;;  %v2621_v29 = vpop.eup %2620  ;;  %v1270_v10 = vmax.f32 %v1222_v9, 1e-24 }
 0x162   : > { %v1271_v28 = vmax.f32 %v1225_v2, 1e-24  ;;  %v2623_v47 = vpop.eup %2622  ;;  %1366 = vst.msk [vmem:[#allocation4 + $0x38] sm:$0xff] %vm1150_vm1, %v1350_v61  ;;  %v1328_v43 = vmul.f32 %v2621_v29, %v3856_v30 }
 0x163   : > { %2632 = vrsqrt.f32 %v1270_v10  ;;  %v1329_v3 = vmul.f32 %v2623_v47, %v3857_v15 }
 0x164   : > { %v1351_v5 = vpack.c.bf16 %v1328_v43, %v1327_v24  ;;  %v1228_v31 = vpop.xlane.xlu1 %1227  ;;  %2634 = vrsqrt.f32 %v1271_v28  ;;  %v3861_v24 = vld [vmem:[#allocation20_spill] sm:$0xff]  ;;  %v3862_v43 = vld [vmem:[#allocation21_spill] sm:$0xff] }
 0x165   : > { %v1231_v48 = vpop.xlane.xlu0 %1230  ;;  %v2625_v41 = vpop.eup %2624  ;;  %v1272_v57 = vmax.f32 %v1228_v31, 1e-24 }
 0x166   : > { %v1273_v4 = vmax.f32 %v1231_v48, 1e-24  ;;  %v2627_v44 = vpop.eup %2626  ;;  %1367 = vst.msk [vmem:[#allocation4 + $0x40] sm:$0xff] %vm1150_vm1, %v1351_v5  ;;  %v1330_v55 = vmul.f32 %v2625_v41, %v3858_v14 }
 0x167   : > { %2636 = vrsqrt.f32 %v1272_v57  ;;  %v1331_v63 = vmul.f32 %v2627_v44, %v3859_v23  ;;  %v3864_v44 = vld [vmem:[#allocation23_spill] sm:$0xff] }
 0x168   : > { %v1352_v50 = vpack.c.bf16 %v1330_v55, %v1329_v3  ;;  %v1234_v60 = vpop.xlane.xlu1 %1233  ;;  %2638 = vrsqrt.f32 %v1273_v4  ;;  %v3863_v3 = vld [vmem:[#allocation22_spill] sm:$0xff] }
 0x169   : > { %v1237_v12 = vpop.xlane.xlu0 %1236  ;;  %v2629_v18 = vpop.eup %2628  ;;  %v1274_v62 = vmax.f32 %v1234_v60, 1e-24 }
 0x16a   : > { %v1275_v33 = vmax.f32 %v1237_v12, 1e-24  ;;  %v2631_v17 = vpop.eup %2630  ;;  %1368 = vst.msk [vmem:[#allocation4 + $0x48] sm:$0xff] %vm1150_vm1, %v1352_v50  ;;  %v1332_v61 = vmul.f32 %v2629_v18, %v3860_v34  ;;  %v3865_v50 = vld [vmem:[#allocation24_spill] sm:$0xff]  ;;  %v3866_v12 = vld [vmem:[#allocation25_spill] sm:$0xff] }
 0x16b   : > { %2640 = vrsqrt.f32 %v1274_v62  ;;  %v1333_v9 = vmul.f32 %v2631_v17, %v3861_v24 }
 0x16c   : > { %v1353_v56 = vpack.c.bf16 %v1332_v61, %v1331_v63  ;;  %v1240_v2 = vpop.xlane.xlu1 %1239  ;;  %2642 = vrsqrt.f32 %v1275_v33  ;;  %v3867_v33 = vld [vmem:[#allocation26_spill] sm:$0xff] }
 0x16d   : > { %v1243_v29 = vpop.xlane.xlu0 %1242  ;;  %v2633_v10 = vpop.eup %2632  ;;  %v1276_v28 = vmax.f32 %v1240_v2, 1e-24  ;;  %v3869_v2 = vld [vmem:[#allocation28_spill] sm:$0xff] }
 0x16e   : > { %v1277_v47 = vmax.f32 %v1243_v29, 1e-24  ;;  %v2635_v30 = vpop.eup %2634  ;;  %1369 = vst.msk [vmem:[#allocation4 + $0x50] sm:$0xff] %vm1150_vm1, %v1353_v56  ;;  %v1334_v5 = vmul.f32 %v2633_v10, %v3862_v43  ;;  %v3868_v56 = vld [vmem:[#allocation27_spill] sm:$0xff] }
 0x16f   : > { %2644 = vrsqrt.f32 %v1276_v28  ;;  %v1335_v31 = vmul.f32 %v2635_v30, %v3863_v3  ;;  %v3870_v28 = vld [vmem:[#allocation29_spill] sm:$0xff] }
 0x170   : > { %v1354_v15 = vpack.c.bf16 %v1334_v5, %v1333_v9  ;;  %v1246_v48 = vpop.xlane.xlu1 %1245  ;;  %2646 = vrsqrt.f32 %v1277_v47 }
 0x171   : > { %v2637_v41 = vpop.eup %2636  ;;  %v1278_v57 = vmax.f32 %v1246_v48, 1e-24 }
 0x172   : > { %v2639_v4 = vpop.eup %2638  ;;  %1370 = vst.msk [vmem:[#allocation4 + $0x58] sm:$0xff] %vm1150_vm1, %v1354_v15  ;;  %v1336_v14 = vmul.f32 %v2637_v41, %v3864_v44 }
 0x173   : > { %2648 = vrsqrt.f32 %v1278_v57  ;;  %v1337_v23 = vmul.f32 %v2639_v4, %v3865_v50 }
 0x174   : > { %v1355_v55 = vpack.c.bf16 %v1336_v14, %v1335_v31 }
 0x175   : > { %v2641_v63 = vpop.eup %2640 }
 0x176   : > { %v2643_v60 = vpop.eup %2642  ;;  %1371 = vst.msk [vmem:[#allocation4 + $0x60] sm:$0xff] %vm1150_vm1, %v1355_v55  ;;  %v1338_v18 = vmul.f32 %v2641_v63, %v3866_v12 }
 0x177   : > { %v1339_v17 = vmul.f32 %v2643_v60, %v3867_v33 }
 0x178   : > { %v1356_v62 = vpack.c.bf16 %v1338_v18, %v1337_v23 }
 0x179   : > { %v2645_v34 = vpop.eup %2644 }
 0x17a   : > { %v2647_v61 = vpop.eup %2646  ;;  %1372 = vst.msk [vmem:[#allocation4 + $0x68] sm:$0xff] %vm1150_vm1, %v1356_v62  ;;  %v1340_v24 = vmul.f32 %v2645_v34, %v3868_v56 }
 0x17b   : > { %v1341_v29 = vmul.f32 %v2647_v61, %v3869_v2 }
 0x17c   : > { %v1357_v9 = vpack.c.bf16 %v1340_v24, %v1339_v17 }
 0x17d   : > { %v2649_v10 = vpop.eup %2648 }
 0x17e   : > { %1373 = vst.msk [vmem:[#allocation4 + $0x70] sm:$0xff] %vm1150_vm1, %v1357_v9  ;;  %v1342_v47 = vmul.f32 %v2649_v10, %v3870_v28 }
 0x180   : > { %v1358_v30 = vpack.c.bf16 %v1342_v47, %v1341_v29 }
 0x182   : > { %1374 = vst.msk [vmem:[#allocation4 + $0x78] sm:$0xff] %vm1150_vm1, %v1358_v30 }
 0x18d   : > { %v927_v43 = vpop.xlane.xlu0 %926 }
 0x18e   : > { %2650 = vrcp.f32 %v927_v43 }
 0x191   : > { %v929_v5 = vpop.xlane.xlu1 %928  ;;  %v931_v15 = vpop.xlane.xlu0 %930 }
 0x192   : > { %2652 = vrcp.f32 %v929_v5 }
 0x193   : > { %2654 = vrcp.f32 %v931_v15 }
 0x195   : > { %v933_v3 = vpop.xlane.xlu1 %932  ;;  %v935_v31 = vpop.xlane.xlu0 %934 }
 0x196   : > { %2656 = vrcp.f32 %v933_v3 }
 0x197   : > { %2658 = vrcp.f32 %v935_v31 }
 0x198   : > { %v2651_v48 = vpop.eup %2650 }
 0x199   : > { %v991_v41 = vmul.f32 %v2651_v48, %v3422_v49  ;;  %v937_v57 = vpop.xlane.xlu1 %936 }
 0x19a   : > { %v939_v4 = vpop.xlane.xlu0 %938  ;;  %2660 = vrcp.f32 %v937_v57 }
 0x19b   : > { %1054 = vst [vmem:[#allocation3] sm:$0xff] %v991_v41  ;;  %2662 = vrcp.f32 %v939_v4 }
 0x19c   : > { %v2653_v44 = vpop.eup %2652 }
 0x19d   : > { %v2655_v14 = vpop.eup %2654  ;;  %v993_v55 = vmul.f32 %v2653_v44, %v3429_v32  ;;  %v941_v50 = vpop.xlane.xlu1 %940 }
 0x19e   : > { %v943_v23 = vpop.xlane.xlu0 %942  ;;  %v995_v63 = vmul.f32 %v2655_v14, %v3427_v36  ;;  %2664 = vrcp.f32 %v941_v50 }
 0x19f   : > { %1055 = vst [vmem:[#allocation3 + $0x8] sm:$0xff] %v993_v55  ;;  %2666 = vrcp.f32 %v943_v23 }
 0x1a0   : > { %v2657_v60 = vpop.eup %2656  ;;  %1056 = vst [vmem:[#allocation3 + $0x10] sm:$0xff] %v995_v63 }
 0x1a1   : > { %v2659_v12 = vpop.eup %2658  ;;  %v997_v49 = vmul.f32 %v2657_v60, %v3437_v27  ;;  %v945_v18 = vpop.xlane.xlu1 %944 }
 0x1a2   : > { %v947_v62 = vpop.xlane.xlu0 %946  ;;  %v999_v33 = vmul.f32 %v2659_v12, %v3435_v40  ;;  %2668 = vrcp.f32 %v945_v18 }
 0x1a3   : > { %1057 = vst [vmem:[#allocation3 + $0x18] sm:$0xff] %v997_v49  ;;  %2670 = vrcp.f32 %v947_v62 }
 0x1a4   : > { %v2661_v32 = vpop.eup %2660  ;;  %1058 = vst [vmem:[#allocation3 + $0x20] sm:$0xff] %v999_v33 }
 0x1a5   : > { %v2663_v17 = vpop.eup %2662  ;;  %v1001_v36 = vmul.f32 %v2661_v32, %v3443_v46  ;;  %v949_v34 = vpop.xlane.xlu1 %948 }
 0x1a6   : > { %v951_v61 = vpop.xlane.xlu0 %950  ;;  %v1003_v56 = vmul.f32 %v2663_v17, %v3445_v19  ;;  %2672 = vrcp.f32 %v949_v34 }
 0x1a7   : > { %1059 = vst [vmem:[#allocation3 + $0x28] sm:$0xff] %v1001_v36  ;;  %2674 = vrcp.f32 %v951_v61 }
 0x1a8   : > { %v2665_v27 = vpop.eup %2664  ;;  %1060 = vst [vmem:[#allocation3 + $0x30] sm:$0xff] %v1003_v56 }
 0x1a9   : > { %v2667_v24 = vpop.eup %2666  ;;  %v1005_v40 = vmul.f32 %v2665_v27, %v3451_v52  ;;  %v953_v9 = vpop.xlane.xlu1 %952 }
 0x1aa   : > { %v955_v2 = vpop.xlane.xlu0 %954  ;;  %v1007_v29 = vmul.f32 %v2667_v24, %v3453_v1  ;;  %2676 = vrcp.f32 %v953_v9 }
 0x1ab   : > { %1061 = vst [vmem:[#allocation3 + $0x38] sm:$0xff] %v1005_v40  ;;  %2678 = vrcp.f32 %v955_v2 }
 0x1ac   : > { %v2669_v46 = vpop.eup %2668  ;;  %1062 = vst [vmem:[#allocation3 + $0x40] sm:$0xff] %v1007_v29 }
 0x1ad   : > { %v2671_v10 = vpop.eup %2670  ;;  %v1009_v19 = vmul.f32 %v2669_v46, %v3459_v58  ;;  %v957_v28 = vpop.xlane.xlu1 %956 }
 0x1ae   : > { %v959_v47 = vpop.xlane.xlu0 %958  ;;  %v1011_v30 = vmul.f32 %v2671_v10, %v3461_v22  ;;  %2680 = vrcp.f32 %v957_v28 }
 0x1af   : > { %1063 = vst [vmem:[#allocation3 + $0x48] sm:$0xff] %v1009_v19  ;;  %2682 = vrcp.f32 %v959_v47 }
 0x1b0   : > { %v2673_v52 = vpop.eup %2672  ;;  %1064 = vst [vmem:[#allocation3 + $0x50] sm:$0xff] %v1011_v30 }
 0x1b1   : > { %v2675_v43 = vpop.eup %2674  ;;  %v1013_v1 = vmul.f32 %v2673_v52, %v3467_v0  ;;  %v961_v5 = vpop.xlane.xlu1 %960  ;;  %v3871_v52 = vld [vmem:[#allocation30_spill] sm:$0xff] }
 0x1b2   : > { %v963_v15 = vpop.xlane.xlu0 %962  ;;  %v1015_v3 = vmul.f32 %v2675_v43, %v3471_v8  ;;  %2684 = vrcp.f32 %v961_v5 }
 0x1b3   : > { %1065 = vst [vmem:[#allocation3 + $0x58] sm:$0xff] %v1013_v1  ;;  %2686 = vrcp.f32 %v963_v15 }
 0x1b4   : > { %v2677_v58 = vpop.eup %2676  ;;  %1066 = vst [vmem:[#allocation3 + $0x60] sm:$0xff] %v1015_v3 }
 0x1b5   : > { %v2679_v31 = vpop.eup %2678  ;;  %v1017_v22 = vmul.f32 %v2677_v58, %v3477_v51  ;;  %v965_v48 = vpop.xlane.xlu1 %964 }
 0x1b6   : > { %v967_v41 = vpop.xlane.xlu0 %966  ;;  %v1019_v57 = vmul.f32 %v2679_v31, %v3479_v54  ;;  %2688 = vrcp.f32 %v965_v48 }
 0x1b7   : > { %1067 = vst [vmem:[#allocation3 + $0x68] sm:$0xff] %v1017_v22  ;;  %2690 = vrcp.f32 %v967_v41 }
 0x1b8   : > { %v2681_v0 = vpop.eup %2680  ;;  %1068 = vst [vmem:[#allocation3 + $0x70] sm:$0xff] %v1019_v57 }
 0x1b9   : > { %v2683_v4 = vpop.eup %2682  ;;  %v1021_v8 = vmul.f32 %v2681_v0, %v3485_v16  ;;  %v969_v44 = vpop.xlane.xlu1 %968 }
 0x1ba   : > { %v659_v14 = vpop.xlane.xlu0 %658  ;;  %v1023_v55 = vmul.f32 %v2683_v4, %v3487_v39  ;;  %2692 = vrcp.f32 %v969_v44 }
 0x1bb   : > { %1069 = vst [vmem:[#allocation3 + $0x78] sm:$0xff] %v1021_v8  ;;  %2694 = vrcp.f32 %v659_v14 }
 0x1bc   : > { %v2685_v51 = vpop.eup %2684  ;;  %1070 = vst [vmem:[#allocation3 + $0x80] sm:$0xff] %v1023_v55 }
 0x1bd   : > { %v2687_v50 = vpop.eup %2686  ;;  %v1025_v54 = vmul.f32 %v2685_v51, %v3493_v26  ;;  %v973_v23 = vpop.xlane.xlu1 %972 }
 0x1be   : > { %v971_v63 = vpop.xlane.xlu0 %970  ;;  %v1027_v60 = vmul.f32 %v2687_v50, %v3495_v45  ;;  %2696 = vrcp.f32 %v973_v23 }
 0x1bf   : > { %1071 = vst [vmem:[#allocation3 + $0x88] sm:$0xff] %v1025_v54  ;;  %2698 = vrcp.f32 %v971_v63 }
 0x1c0   : > { %v2689_v16 = vpop.eup %2688  ;;  %1072 = vst [vmem:[#allocation3 + $0x90] sm:$0xff] %v1027_v60 }
 0x1c1   : > { %v2691_v12 = vpop.eup %2690  ;;  %v1029_v39 = vmul.f32 %v2689_v16, %v3501_v6  ;;  %v977_v49 = vpop.xlane.xlu1 %976 }
 0x1c2   : > { %v975_v18 = vpop.xlane.xlu0 %974  ;;  %v1031_v62 = vmul.f32 %v2691_v12, %v3503_v7  ;;  %2700 = vrcp.f32 %v977_v49 }
 0x1c3   : > { %1073 = vst [vmem:[#allocation3 + $0x98] sm:$0xff] %v1029_v39  ;;  %2702 = vrcp.f32 %v975_v18 }
 0x1c4   : > { %v2693_v26 = vpop.eup %2692  ;;  %1074 = vst [vmem:[#allocation3 + $0xa0] sm:$0xff] %v1031_v62 }
 0x1c5   : > { %v2695_v33 = vpop.eup %2694  ;;  %v1033_v45 = vmul.f32 %v2693_v26, %v3511_v21  ;;  %v981_v32 = vpop.xlane.xlu1 %980 }
 0x1c6   : > { %v979_v17 = vpop.xlane.xlu0 %978  ;;  %v661_v36 = vmul.f32 %v2695_v33, %v3505_v11  ;;  %2704 = vrcp.f32 %v981_v32 }
 0x1c7   : > { %1075 = vst [vmem:[#allocation3 + $0xa8] sm:$0xff] %v1033_v45  ;;  %2706 = vrcp.f32 %v979_v17 }
 0x1c8   : > { %v2697_v6 = vpop.eup %2696  ;;  %662 = vst [vmem:[#allocation2] sm:$0x3] %v661_v36 }
 0x1c9   : > { %v2699_v34 = vpop.eup %2698  ;;  %v1037_v7 = vmul.f32 %v2697_v6, %v3520_v53  ;;  %v985_v61 = vpop.xlane.xlu1 %984 }
 0x1ca   : > { %v983_v56 = vpop.xlane.xlu0 %982  ;;  %v1035_v27 = vmul.f32 %v2699_v34, %v3518_v20  ;;  %2708 = vrcp.f32 %v985_v61 }
 0x1cb   : > { %1077 = vst [vmem:[#allocation3 + $0xb8] sm:$0xff] %v1037_v7  ;;  %2710 = vrcp.f32 %v983_v56 }
 0x1cc   : > { %v2701_v21 = vpop.eup %2700  ;;  %1076 = vst [vmem:[#allocation3 + $0xb0] sm:$0xff] %v1035_v27 }
 0x1cd   : > { %v2703_v24 = vpop.eup %2702  ;;  %v1041_v11 = vmul.f32 %v2701_v21, %v3527_v59 }
 0x1ce   : > { %v989_v40 = vpop.xlane.xlu1 %988  ;;  %v987_v9 = vpop.xlane.xlu0 %986  ;;  %v1039_v2 = vmul.f32 %v2703_v24, %v3525_v25 }
 0x1cf   : > { %2712 = vrcp.f32 %v989_v40  ;;  %1079 = vst [vmem:[#allocation3 + $0xc8] sm:$0xff] %v1041_v11 }
 0x1d0   : > { %2714 = vrcp.f32 %v987_v9  ;;  %v2705_v53 = vpop.eup %2704  ;;  %1078 = vst [vmem:[#allocation3 + $0xc0] sm:$0xff] %v1039_v2 }
 0x1d1   : > { %v2707_v29 = vpop.eup %2706  ;;  %v1045_v20 = vmul.f32 %v2705_v53, %v3533_v42 }
 0x1d2   : > { %v1043_v46 = vmul.f32 %v2707_v29, %v3531_v35 }
 0x1d3   : > { %1081 = vst [vmem:[#allocation3 + $0xd8] sm:$0xff] %v1045_v20 }
 0x1d4   : > { %v2709_v10 = vpop.eup %2708  ;;  %1080 = vst [vmem:[#allocation3 + $0xd0] sm:$0xff] %v1043_v46 }
 0x1d5   : > { %v2711_v19 = vpop.eup %2710  ;;  %v1049_v59 = vmul.f32 %v2709_v10, %v3539_v13 }
 0x1d6   : > { %v1047_v28 = vmul.f32 %v2711_v19, %v3537_v37 }
 0x1d7   : > { %1083 = vst [vmem:[#allocation3 + $0xe8] sm:$0xff] %v1049_v59 }
 0x1d8   : > { %1082 = vst [vmem:[#allocation3 + $0xe0] sm:$0xff] %v1047_v28 }
 0x1d9   : > { %v2713_v25 = vpop.eup %2712 }
 0x1da   : > { %v2715_v47 = vpop.eup %2714  ;;  %v1053_v30 = vmul.f32 %v2713_v25, %v3545_v38 }
 0x1db   : > { %v1051_v43 = vmul.f32 %v2715_v47, %v3871_v52 }
 0x1dc   : > { %1085 = vst [vmem:[#allocation3 + $0xf8] sm:$0xff] %v1053_v30 }
 0x1dd   : > { %1084 = vst [vmem:[#allocation3 + $0xf0] sm:$0xff] %v1051_v43 }
 0x1de PF: > { %v3631_v35 = vld [vmem:[%s3008_s11 + $0x10] sm:$0xff]  ;;  %vm1479_vm2 = vcmask 523264   ;;  %v3634_v42 = vld [vmem:[%s3008_s11] sm:$0xff]  ;;  %v3637_v37 = vld [vmem:[%s3008_s11 + $0x18] sm:$0xff]  ;;  %v2837_v15 = vmov 0.0   ;;  %vm2838_vm3 = vmmov 0   ;;  %v1658_v43 = vlaneseq }
 0x1df   : > { %v1477_v13 = vmul.f32 %v3631_v35, %v3631_v35  ;;  %v1475_v38 = vmul.f32 %v3634_v42, %v3634_v42  ;;  %v1478_v1 = vmul.f32 %v3637_v37, %v3637_v37  ;;  %v3646_v5 = vld [vmem:[%s3008_s11 + $0x8] sm:$0xff]  ;;  %2283 = vmatprep.subr.bf16.mxu0 %v2837_v15  ;;  %2303 = vmatprep.subr.bf16.mxu1 %v2837_v15  ;;  %v1508_v51 = vld [vmem:[#allocation4 + $0x10] sm:$0xff]  ;;  %v1509_v63 = vld [vmem:[#allocation4 + $0x18] sm:$0xff]  ;;  %vm1388_vm1 = vcmask 1041408   ;;  %s3760_s11 = sld [smem:[#allocation7 + %s2983_s13]] }
 0x1e0   : > { %v1506_v3 = vld [vmem:[#allocation4] sm:$0xff]  ;;  %v1476_v31 = vmul.f32 %v3646_v5, %v3646_v5  ;;  %v1507_v8 = vld [vmem:[#allocation4 + $0x8] sm:$0xff]  ;;  %v1516_v50 = vld [vmem:[#allocation4 + $0x50] sm:$0xff]  ;;  %v1532_v54 = vsel %vm1479_vm2, %v1508_v51, 0  ;;  %v1535_v16 = vsel %vm1479_vm2, %v1509_v63, 0  ;;  %2299 = vmatprep.mubr.msk.bf16.mxu0 %vm2838_vm3, %v2837_v15  ;;  %2319 = vmatprep.mubr.msk.bf16.mxu1 %vm2838_vm3, %v2837_v15  ;;  %vm1990_vm3 = vcmask 130112  }
 0x1e1   : > { %v1514_v58 = vld [vmem:[#allocation4 + $0x40] sm:$0xff]  ;;  %v1526_v22 = vsel %vm1479_vm2, %v1506_v3, 0  ;;  %v1486_v41 = vsel %vm1479_vm2, %v1477_v13, 0.0  ;;  %v1480_v57 = vsel %vm1479_vm2, %v1475_v38, 0.0  ;;  %v1489_v0 = vsel %vm1479_vm2, %v1478_v1, 0.0  ;;  %v1515_v44 = vld [vmem:[#allocation4 + $0x48] sm:$0xff] }
 0x1e2   : > { %v1594_v48 = vsel %vm1479_vm2, %v1514_v58, 0  ;;  %2284 = vmatpush3.bf16.xpose.msra.mxu0 %v1526_v22  ;;  %1487 = vadd.xlane.f32.xlu1 %v1486_v41  ;;  %v1483_v4 = vsel %vm1479_vm2, %v1476_v31, 0.0  ;;  %v1529_v14 = vsel %vm1479_vm2, %v1507_v8, 0  ;;  %v1597_v55 = vsel %vm1479_vm2, %v1515_v44, 0  ;;  %v1517_v60 = vld [vmem:[#allocation4 + $0x58] sm:$0xff]  ;;  %v1510_v39 = vld [vmem:[#allocation4 + $0x20] sm:$0xff] }
 0x1e3   : > { %2304 = vmatpush3.bf16.xpose.msra.mxu1 %v1594_v48  ;;  %1481 = vadd.xlane.f32.xlu0 %v1480_v57  ;;  %v1600_v23 = vsel %vm1479_vm2, %v1516_v50, 0  ;;  %v1603_v12 = vsel %vm1479_vm2, %v1517_v60, 0  ;;  %v1518_v49 = vld [vmem:[#allocation4 + $0x60] sm:$0xff]  ;;  %v1538_v18 = vsel %vm1479_vm2, %v1510_v39, 0  ;;  %v1511_v26 = vld [vmem:[#allocation4 + $0x28] sm:$0xff]  ;;  %v1512_v17 = vld [vmem:[#allocation4 + $0x30] sm:$0xff] }
 0x1e4   : > { %2285 = vmatprep.subr.bf16.mxu0 %v2837_v15  ;;  %2305 = vmatprep.subr.bf16.mxu1 %v2837_v15  ;;  %v1606_v62 = vsel %vm1479_vm2, %v1518_v49, 0  ;;  %v1519_v33 = vld [vmem:[#allocation4 + $0x68] sm:$0xff]  ;;  %v1541_v45 = vsel %vm1479_vm2, %v1511_v26, 0  ;;  %v1520_v36 = vld [vmem:[#allocation4 + $0x70] sm:$0xff]  ;;  %v1544_v6 = vsel %vm1479_vm2, %v1512_v17, 0  ;;  %v1513_v7 = vld [vmem:[#allocation4 + $0x38] sm:$0xff] }
 0x1e5   : > { %v1609_v32 = vsel %vm1479_vm2, %v1519_v33, 0  ;;  %v1612_v34 = vsel %vm1479_vm2, %v1520_v36, 0  ;;  %v1521_v61 = vld [vmem:[#allocation4 + $0x78] sm:$0xff]  ;;  %v1547_v56 = vsel %vm1479_vm2, %v1513_v7, 0  ;;  %v3695_v13 = vand.u32 127, %v1658_v43  ;;  %v1749_v49 = vld [vmem:[#allocation3] sm:$0xff]  ;;  %s2008_s13 = scvt.s32.f32 %s3760_s11 }
 0x1e6   : > { %1490 = vadd.xlane.f32.xlu1 %v1489_v0  ;;  %v1615_v27 = vsel %vm1479_vm2, %v1521_v61, 0  ;;  %v1766_v33 = vld [vmem:[#allocation3 + $0x88] sm:$0xff]  ;;  %v1753_v7 = vld [vmem:[#allocation3 + $0x20] sm:$0xff] }
 0x1e7   : > { %1484 = vadd.xlane.f32.xlu0 %v1483_v4  ;;  %vm1660_vm4 = vcmp.lt.s32.totalorder %v3695_v13, 16 }
 0x1ea   : > { %2286 = vmatpush3.bf16.xpose.msra.mxu0 %v1529_v14 }
 0x1eb   : > { %2306 = vmatpush3.bf16.xpose.msra.mxu1 %v1597_v55  ;;  %2287 = vmatprep.subr.bf16.mxu0 %v2837_v15 }
 0x1ec   : > { %2307 = vmatprep.subr.bf16.mxu1 %v2837_v15 }
 0x1f2   : > { %2288 = vmatpush3.bf16.xpose.msra.mxu0 %v1532_v54 }
 0x1f3   : > { %2308 = vmatpush3.bf16.xpose.msra.mxu1 %v1600_v23  ;;  %2289 = vmatprep.subr.bf16.mxu0 %v2837_v15 }
 0x1f4   : > { %2309 = vmatprep.subr.bf16.mxu1 %v2837_v15 }
 0x1fa   : > { %2290 = vmatpush3.bf16.xpose.msra.mxu0 %v1535_v16 }
 0x1fb   : > { %2310 = vmatpush3.bf16.xpose.msra.mxu1 %v1603_v12  ;;  %2291 = vmatprep.subr.bf16.mxu0 %v2837_v15 }
 0x1fc   : > { %2311 = vmatprep.subr.bf16.mxu1 %v2837_v15 }
 0x202   : > { %2292 = vmatpush3.bf16.xpose.msra.mxu0 %v1538_v18  ;;  %v1750_v18 = vld [vmem:[#allocation3 + $0x8] sm:$0xff] }
 0x203   : > { %2312 = vmatpush3.bf16.xpose.msra.mxu1 %v1606_v62  ;;  %2293 = vmatprep.subr.bf16.mxu0 %v2837_v15  ;;  %v1765_v62 = vld [vmem:[#allocation3 + $0x80] sm:$0xff]  ;;  %v2393_v26 = vpack.c.bf16 %v1750_v18, %v1749_v49  ;;  %v1425_v49 = vld [vmem:[%s3003_s5 + $0x10] sm:$0xff] }
 0x204   : > { %2313 = vmatprep.subr.bf16.mxu1 %v2837_v15  ;;  %v2425_v17 = vpack.c.bf16 %v1766_v33, %v1765_v62  ;;  %v1762_v62 = vld [vmem:[#allocation3 + $0x68] sm:$0xff] }
 0x20a   : > { %2294 = vmatpush3.bf16.xpose.msra.mxu0 %v1541_v45  ;;  %v1751_v45 = vld [vmem:[#allocation3 + $0x10] sm:$0xff] }
 0x20b   : > { %2314 = vmatpush3.bf16.xpose.msra.mxu1 %v1609_v32  ;;  %2295 = vmatprep.subr.bf16.mxu0 %v2837_v15  ;;  %v1752_v32 = vld [vmem:[#allocation3 + $0x18] sm:$0xff] }
 0x20c   : > { %2315 = vmatprep.subr.bf16.mxu1 %v2837_v15  ;;  %v2397_v36 = vpack.c.bf16 %v1752_v32, %v1751_v45  ;;  %v1778_v45 = vld [vmem:[#allocation3 + $0xe8] sm:$0xff] }
 0x212   : > { %2296 = vmatpush3.bf16.xpose.msra.mxu0 %v1544_v6  ;;  %v1767_v6 = vld [vmem:[#allocation3 + $0x90] sm:$0xff] }
 0x213   : > { %2316 = vmatpush3.bf16.xpose.msra.mxu1 %v1612_v34  ;;  %2297 = vmatprep.subr.bf16.mxu0 %v2837_v15  ;;  %v1768_v34 = vld [vmem:[#allocation3 + $0x98] sm:$0xff] }
 0x214   : > { %2317 = vmatprep.subr.bf16.mxu1 %v2837_v15  ;;  %v2429_v61 = vpack.c.bf16 %v1768_v34, %v1767_v6  ;;  %v1779_v6 = vld [vmem:[#allocation3 + $0xf0] sm:$0xff] }
 0x21a   : > { %2298 = vmatpush3.bf16.xpose.msra.mxu0 %v1547_v56  ;;  %v1754_v56 = vld [vmem:[#allocation3 + $0x28] sm:$0xff] }
 0x21b   : > { %2318 = vmatpush3.bf16.xpose.msra.mxu1 %v1615_v27  ;;  %2394 = vmatprep.subr.bf16.mxu0 %v2393_v26  ;;  %v1769_v27 = vld [vmem:[#allocation3 + $0xa0] sm:$0xff] }
 0x21c   : > { %2426 = vmatprep.subr.bf16.mxu1 %v2425_v17 }
 0x26f   : > { %v1488_v21 = vpop.xlane.xlu1 %1487 }
 0x270   : > { %v1482_v24 = vpop.xlane.xlu0 %1481  ;;  %v1494_v11 = vmax.f32 %v1488_v21, 1e-24  ;;  %v1770_v21 = vld [vmem:[#allocation3 + $0xa8] sm:$0xff] }
 0x271   : > { %v1492_v40 = vmax.f32 %v1482_v24, 1e-24  ;;  %v2401_v24 = vpack.c.bf16 %v1754_v56, %v1753_v7  ;;  %v1780_v7 = vld [vmem:[#allocation3 + $0xf8] sm:$0xff] }
 0x272   : > { %2717 = vrsqrt.f32 %v1494_v11  ;;  %v2433_v11 = vpack.c.bf16 %v1770_v21, %v1769_v27 }
 0x273   : > { %v1491_v9 = vpop.xlane.xlu1 %1490  ;;  %2719 = vrsqrt.f32 %v1492_v40  ;;  %v1755_v40 = vld [vmem:[#allocation3 + $0x30] sm:$0xff] }
 0x274   : > { %v1485_v2 = vpop.xlane.xlu0 %1484  ;;  %v1495_v53 = vmax.f32 %v1491_v9, 1e-24  ;;  %v1756_v9 = vld [vmem:[#allocation3 + $0x38] sm:$0xff] }
 0x275   : > { %v1493_v29 = vmax.f32 %v1485_v2, 1e-24  ;;  %v1771_v2 = vld [vmem:[#allocation3 + $0xb0] sm:$0xff] }
 0x276   : > { %2721 = vrsqrt.f32 %v1495_v53  ;;  %v1772_v53 = vld [vmem:[#allocation3 + $0xb8] sm:$0xff] }
 0x277   : > { %2723 = vrsqrt.f32 %v1493_v29  ;;  %v2405_v29 = vpack.c.bf16 %v1756_v9, %v1755_v40 }
 0x27c   : > { %v2718_v20 = vpop.eup %2717 }
 0x27d   : > { %v2720_v46 = vpop.eup %2719  ;;  %v1502_v10 = vmul.f32 %v2718_v20, %v3631_v35  ;;  %v2437_v20 = vpack.c.bf16 %v1772_v53, %v1771_v2 }
 0x27e   : > { %v1500_v25 = vmul.f32 %v2720_v46, %v3634_v42  ;;  %v1757_v46 = vld [vmem:[#allocation3 + $0x40] sm:$0xff] }
 0x280   : > { %v2722_v19 = vpop.eup %2721 }
 0x281   : > { %v2724_v59 = vpop.eup %2723  ;;  %v1503_v28 = vmul.f32 %v2722_v19, %v3637_v37  ;;  %v1773_v19 = vld [vmem:[#allocation3 + $0xc0] sm:$0xff] }
 0x282   : > { %v1501_v47 = vmul.f32 %v2724_v59, %v3646_v5  ;;  %v1774_v59 = vld [vmem:[#allocation3 + $0xc8] sm:$0xff] }
 0x283   : > { %v1505_v30 = vpack.c.bf16 %v1503_v28, %v1502_v10  ;;  %v1758_v10 = vld [vmem:[#allocation3 + $0x48] sm:$0xff] }
 0x284   : > { %v1504_v52 = vpack.c.bf16 %v1501_v47, %v1500_v25  ;;  %v2409_v28 = vpack.c.bf16 %v1758_v10, %v1757_v46  ;;  %v2441_v25 = vpack.c.bf16 %v1774_v59, %v1773_v19  ;;  %v1759_v47 = vld [vmem:[#allocation3 + $0x50] sm:$0xff] }
 0x285   : > { %2320 = vmatmul.mubr.msk.bf16.vlgmr.msra.gmra.mrb[0].mxu1 %vm1479_vm2, %v1505_v30  ;;  %v1760_v30 = vld [vmem:[#allocation3 + $0x58] sm:$0xff] }
 0x286   : > { %2300 = vmatmul.mubr.msk.bf16.vlgmr.msra.gmra.mrb[0].mxu0 %vm1479_vm2, %v1504_v52  ;;  %2428 = vmatpush3.bf16.msra.mxu1 %v2425_v17  ;;  %v1775_v52 = vld [vmem:[#allocation3 + $0xd0] sm:$0xff] }
 0x287   : > { %2396 = vmatpush3.bf16.msra.mxu0 %v2393_v26  ;;  %2430 = vmatprep.subr.bf16.mxu1 %v2429_v61  ;;  %v1777_v26 = vld [vmem:[#allocation3 + $0xe0] sm:$0xff]  ;;  %v1763_v17 = vld [vmem:[#allocation3 + $0x70] sm:$0xff] }
 0x288   : > { %2398 = vmatprep.subr.bf16.mxu0 %v2397_v36  ;;  %v2449_v32 = vpack.c.bf16 %v1778_v45, %v1777_v26 }
 0x28a   : > { %2432 = vmatpush3.bf16.msra.mxu1 %v2429_v61  ;;  %v2453_v61 = vpack.c.bf16 %v1780_v7, %v1779_v6 }
 0x28b   : > { %2400 = vmatpush3.bf16.msra.mxu0 %v2397_v36  ;;  %2434 = vmatprep.subr.bf16.mxu1 %v2433_v11  ;;  %v1764_v36 = vld [vmem:[#allocation3 + $0x78] sm:$0xff] }
 0x28c   : > { %2402 = vmatprep.subr.bf16.mxu0 %v2401_v24  ;;  %v2421_v34 = vpack.c.bf16 %v1764_v36, %v1763_v17 }
 0x28e   : > { %2436 = vmatpush3.bf16.msra.mxu1 %v2433_v11 }
 0x28f   : > { %2404 = vmatpush3.bf16.msra.mxu0 %v2401_v24  ;;  %2438 = vmatprep.subr.bf16.mxu1 %v2437_v20 }
 0x290   : > { %2406 = vmatprep.subr.bf16.mxu0 %v2405_v29 }
 0x292   : > { %2440 = vmatpush3.bf16.msra.mxu1 %v2437_v20 }
 0x293   : > { %2408 = vmatpush3.bf16.msra.mxu0 %v2405_v29  ;;  %2442 = vmatprep.subr.bf16.mxu1 %v2441_v25 }
 0x294   : > { %2410 = vmatprep.subr.bf16.mxu0 %v2409_v28 }
 0x296   : > { %2444 = vmatpush3.bf16.msra.mxu1 %v2441_v25 }
 0x297   : > { %2412 = vmatpush3.bf16.msra.mxu0 %v2409_v28 }
 0x358   : > { %v1651_v35 = vpop.f32.mrb[0].mxu1 }
 0x359   : > { %v1583_v38 = vpop.f32.mrb[0].mxu0  ;;  %v2321_v1 = vpop.f32.mrb[1].mxu1  ;;  %v1663_v37 = vsel %vm1660_vm4, %v1651_v35, -1e+30  ;;  %v1776_v35 = vld [vmem:[#allocation3 + $0xd8] sm:$0xff] }
 0x35a   : > { %v2301_v3 = vpop.f32.mrb[1].mxu0  ;;  %1669 = vmax.xlane.f32.xlu1 %v1663_v37  ;;  %v1654_v42 = vpop.f32.mrb[2].mxu1  ;;  %v1661_v5 = vsel %vm1660_vm4, %v1583_v38, -1e+30  ;;  %v2413_v38 = vpack.c.bf16 %v1760_v30, %v1759_v47  ;;  %v2445_v1 = vpack.c.bf16 %v1776_v35, %v1775_v52  ;;  %v2839_v30 = vmov 1.0  }
 0x35b   : > { %1665 = vmax.xlane.f32.xlu0 %v1661_v5  ;;  %v1586_v58 = vpop.f32.mrb[2].mxu0  ;;  %v2322_v31 = vpop.f32.mrb[3].mxu1  ;;  %v1664_v48 = vsel %vm1660_vm4, %v1654_v42, -1e+30 }
 0x35c   : > { %v2302_v22 = vpop.f32.mrb[3].mxu0  ;;  %v1662_v41 = vsel %vm1660_vm4, %v1586_v58, -1e+30  ;;  %2414 = vmatprep.subr.bf16.mxu0 %v2413_v38  ;;  %2446 = vmatprep.subr.bf16.mxu1 %v2445_v1  ;;  %vm2001_vm4 = vcmask 1041409  }
 0x35d   : > { %2416 = vmatpush3.bf16.msra.mxu0 %v2413_v38  ;;  %2448 = vmatpush3.bf16.msra.mxu1 %v2445_v1 }
 0x35e   : > { %1671 = vmax.xlane.f32.xlu1 %v1664_v48  ;;  %2450 = vmatprep.subr.bf16.mxu1 %v2449_v32 }
 0x35f   : > { %1667 = vmax.xlane.f32.xlu0 %v1662_v41 }
 0x361   : > { %2452 = vmatpush3.bf16.msra.mxu1 %v2449_v32 }
 0x362   : > { %2454 = vmatprep.subr.bf16.mxu1 %v2453_v61 }
 0x365   : > { %2456 = vmatpush3.bf16.msra.mxu1 %v2453_v61 }
 0x3e7   : > { %v1670_v57 = vpop.xlane.xlu1 %1669 }
 0x3e8   : > { %vm1675_vm5 = vcmp.ge.f32.partialorder %v1663_v37, %v1670_v57  ;;  %v1666_v0 = vpop.xlane.xlu0 %1665  ;;  %v1385_v37 = vstv %s2993_s18 }
 0x3e9   : > { %v3699_v4 = vsel %vm1675_vm5, %v3695_v13, 128  ;;  %vm1673_vm6 = vcmp.ge.f32.partialorder %v1661_v5, %v1666_v0  ;;  %2725 = vrcp.f32 %v1385_v37  ;;  %vm2004_vm5 = vcmask 123904  }
 0x3ea   : > { %v3702_v8 = vsel %vm1673_vm6, %v3695_v13, 128  ;;  %v1710_v44 = vshra.s32 %v3699_v4, 16  ;;  %v1709_v3 = vand.u32 65535, %v3699_v4  ;;  %vm2014_vm6 = vcmask 1024  }
 0x3eb   : > { %v1672_v14 = vpop.xlane.xlu1 %1671  ;;  %v1682_v55 = vshra.s32 %v3702_v8, 16  ;;  %v1681_v42 = vand.u32 65535, %v3702_v8 }
 0x3ec   : > { %vm1676_vm7 = vcmp.ge.f32.partialorder %v1664_v48, %v1672_v14  ;;  %v1668_v51 = vpop.xlane.xlu0 %1667  ;;  %v3706_v50 = vcvt.s32.f32 %v1710_v44  ;;  %v1711_v31 = vcvt.s32.f32 %v1709_v3  ;;  %v1424_v14 = vld [vmem:[%s3003_s5 + $0x8] sm:$0xff] }
 0x3ed   : > { %v3709_v54 = vsel %vm1676_vm7, %v3695_v13, 128  ;;  %vm1674_vm8 = vcmp.ge.f32.partialorder %v1662_v41, %v1668_v51  ;;  %v3711_v23 = vcvt.s32.f32 %v1682_v55  ;;  %v1683_v41 = vcvt.s32.f32 %v1681_v42 }
 0x3ee   : > { %v3714_v63 = vsel %vm1674_vm8, %v3695_v13, 128  ;;  %1713 = vmin.xlane.f32.xlu1 %v3706_v50  ;;  %v1724_v60 = vshra.s32 %v3709_v54, 16  ;;  %v1723_v5 = vand.u32 65535, %v3709_v54  ;;  %v1423_v54 = vld [vmem:[%s3003_s5] sm:$0xff] }
 0x3ef   : > { %1685 = vmin.xlane.f32.xlu0 %v3711_v23  ;;  %v1696_v16 = vshra.s32 %v3714_v63, 16  ;;  %v1695_v22 = vand.u32 65535, %v3714_v63 }
 0x3f0   : > { %v3720_v12 = vcvt.s32.f32 %v1724_v60  ;;  %v1725_v44 = vcvt.s32.f32 %v1723_v5 }
 0x3f1   : > { %v3722_v39 = vcvt.s32.f32 %v1696_v16  ;;  %v1697_v51 = vcvt.s32.f32 %v1695_v22  ;;  %v1426_v16 = vld [vmem:[%s3003_s5 + $0x18] sm:$0xff] }
 0x3f2   : > { %1727 = vmin.xlane.f32.xlu1 %v3720_v12 }
 0x3f3   : > { %1699 = vmin.xlane.f32.xlu0 %v3722_v39  ;;  %v3733_v4 = vpop.eup %2725 }
 0x3f4   : > { %v1428_v63 = vmul.f32 %v3733_v4, %v1424_v14  ;;  %v1427_v60 = vmul.f32 %v3733_v4, %v1423_v54  ;;  %v1430_v18 = vmul.f32 %v3733_v4, %v1426_v16 }
 0x47b   : > { %v1714_v58 = vpop.xlane.xlu1 %1713 }
 0x47c   : > { %v1686_v48 = vpop.xlane.xlu0 %1685  ;;  %vm1715_vm9 = vcmp.eq.f32.partialorder %v3706_v50, %v1714_v58  ;;  %v1720_v56 = vcvt.f32.s32 %v1714_v58 }
 0x47d   : > { %v1716_v57 = vsel %vm1715_vm9, %v1711_v31, inf  ;;  %vm1687_vm10 = vcmp.eq.f32.partialorder %v3711_v23, %v1686_v48  ;;  %v1692_v27 = vcvt.f32.s32 %v1686_v48 }
 0x47e   : > { %1717 = vmin.xlane.f32.xlu1 %v1716_v57  ;;  %v1688_v0 = vsel %vm1687_vm10, %v1683_v41, inf  ;;  %v1721_v24 = vshll.u32 %v1720_v56, 16 }
 0x47f   : > { %1689 = vmin.xlane.f32.xlu0 %v1688_v0  ;;  %v1728_v8 = vpop.xlane.xlu1 %1727  ;;  %v1693_v2 = vshll.u32 %v1692_v27, 16 }
 0x480   : > { %v1700_v55 = vpop.xlane.xlu0 %1699  ;;  %vm1729_vm11 = vcmp.eq.f32.partialorder %v3720_v12, %v1728_v8  ;;  %v3745_v12 = vmul.f32 %v3733_v4, %v1425_v49  ;;  %v1734_v11 = vcvt.f32.s32 %v1728_v8  ;;  %v1384_v8 = vld [vmem:[%s2998_s30] sm:$0x3] }
 0x481   : > { %v1730_v50 = vsel %vm1729_vm11, %v1725_v44, inf  ;;  %vm1701_vm12 = vcmp.eq.f32.partialorder %v3722_v39, %v1700_v55  ;;  %v1761_v39 = vld [vmem:[#allocation3 + $0x60] sm:$0xff]  ;;  %v1706_v53 = vcvt.f32.s32 %v1700_v55  ;;  %v3755_v14 = vmul.f32 %v3733_v4, %v1384_v8 }
 0x482   : > { %1731 = vmin.xlane.f32.xlu1 %v1730_v50  ;;  %v1702_v23 = vsel %vm1701_vm12, %v1697_v51, inf  ;;  %v2417_v33 = vpack.c.bf16 %v1762_v62, %v1761_v39  ;;  %v1735_v19 = vshll.u32 %v1734_v11, 16 }
 0x483   : > { %1703 = vmin.xlane.f32.xlu0 %v1702_v23  ;;  %v1707_v25 = vshll.u32 %v1706_v53, 16  ;;  %v1389_v54 = vsel %vm1388_vm1, %v3755_v14, -inf }
 0x484   : > { %2418 = vmatprep.subr.bf16.mxu0 %v2417_v33 }
 0x485   : > { %2420 = vmatpush3.bf16.msra.mxu0 %v2417_v33 }
 0x486   : > { %1433 = vmax.xlane.f32.xlu1 %v1428_v63  ;;  %2422 = vmatprep.subr.bf16.mxu0 %v2421_v34 }
 0x487   : > { %1431 = vmax.xlane.f32.xlu0 %v1427_v60 }
 0x489   : > { %2424 = vmatpush3.bf16.msra.mxu0 %v2421_v34 }
 0x48a   : > { %1437 = vmax.xlane.f32.xlu1 %v1430_v18 }
 0x48b   : > { %1435 = vmax.xlane.f32.xlu0 %v3745_v12 }
 0x50b   : > { %v1718_v21 = vpop.xlane.xlu1 %1717 }
 0x50c   : > { %v1719_v40 = vcvt.f32.s32 %v1718_v21  ;;  %v1690_v9 = vpop.xlane.xlu0 %1689 }
 0x50d   : > { %v1691_v29 = vcvt.f32.s32 %v1690_v9 }
 0x50e   : > { %v1722_v20 = vadd.s32 %v1721_v24, %v1719_v40 }
 0x50f   : > { %v1694_v46 = vadd.s32 %v1693_v2, %v1691_v29  ;;  %v1732_v10 = vpop.xlane.xlu1 %1731  ;;  %v1947_v2 = vstv %s3760_s11  ;;  %v2840_v29 = vmov 0  }
 0x510   : > { %v1733_v59 = vcvt.f32.s32 %v1732_v10  ;;  %v1704_v28 = vpop.xlane.xlu0 %1703  ;;  %vm1739_vm13 = vcmp.eq.s32.totalorder %v3695_v13, %v1722_v20  ;;  %vm1948_vm2 = vcmp.lt.s32.totalorder %v3695_v13, %v1947_v2  ;;  %2716 = vset.pattern.permute.xlu0 %v2840_v29 }
 0x511   : > { %v1705_v47 = vcvt.f32.s32 %v1704_v28  ;;  %vm1737_vm14 = vcmp.eq.s32.totalorder %v3695_v13, %v1694_v46  ;;  %2390 = vmatprep.mubr.msk.f32.mxu1 %vm1739_vm13, %v2839_v30  ;;  %v2220_v53 = vsel %vm1948_vm2, 1.0, %v2837_v15 }
 0x512   : > { %v1736_v52 = vadd.s32 %v1735_v19, %v1733_v59  ;;  %2355 = vmatprep.mubr.msk.f32.mxu0 %vm1737_vm14, %v2839_v30 }
 0x513   : > { %v1708_v35 = vadd.s32 %v1707_v25, %v1705_v47  ;;  %v1434_v38 = vpop.xlane.xlu1 %1433 }
 0x514   : > { %vm1740_vm15 = vcmp.eq.s32.totalorder %v3695_v13, %v1736_v52  ;;  %v1440_v1 = vsub.f32 %v1428_v63, %v1434_v38  ;;  %v1432_v37 = vpop.xlane.xlu0 %1431 }
 0x515   : > { %vm1738_vm0 = vcmp.eq.s32.totalorder %v3695_v13, %v1708_v35  ;;  %v1439_v3 = vsub.f32 %v1427_v60, %v1432_v37  ;;  %2391 = vmatmul.mubr.msk.f32.vlgmr.msra.gmra.mrb[4].mxu1 %vm1740_vm15, %v2839_v30 }
 0x516   : > { %v1445_v42 = vmul.f32 1.442695, %v1440_v1  ;;  %2356 = vmatmul.mubr.msk.f32.vlgmr.msra.gmra.mrb[4].mxu0 %vm1738_vm0, %v2839_v30 }
 0x517   : > { %v1443_v5 = vmul.f32 1.442695, %v1439_v3  ;;  %v1438_v58 = vpop.xlane.xlu1 %1437 }
 0x518   : > { %2727 = vpow2.f32 %v1445_v42  ;;  %v1442_v31 = vsub.f32 %v1430_v18, %v1438_v58  ;;  %v1436_v22 = vpop.xlane.xlu0 %1435  ;;  %v1383_v42 = vld [vmem:[#allocation2] sm:$0x3] }
 0x519   : > { %2729 = vpow2.f32 %v1443_v5  ;;  %v1441_v48 = vsub.f32 %v3745_v12, %v1436_v22 }
 0x51a   : > { %v1449_v41 = vmul.f32 1.442695, %v1442_v31 }
 0x51b   : > { %v1447_v57 = vmul.f32 1.442695, %v1441_v48 }
 0x51c   : > { %2731 = vpow2.f32 %v1449_v41 }
 0x51d   : > { %2733 = vpow2.f32 %v1447_v57  ;;  %v1407_v57 = vsub.f32 %v1383_v42, %v3755_v14 }
 0x522   : > { %v2728_v0 = vpop.eup %2727 }
 0x523   : > { %v2730_v44 = vpop.eup %2729  ;;  %1453 = vadd.xlane.f32.xlu1 %v2728_v0  ;;  %v1408_v0 = vand.u32 2147483647, %v1407_v57 }
 0x524   : > { %1451 = vadd.xlane.f32.xlu0 %v2730_v44 }
 0x525   : > { %v1409_v8 = vsel %vm1388_vm1, %v1408_v0, 0.0 }
 0x526   : > { %v2732_v55 = vpop.eup %2731 }
 0x527   : > { %v2734_v51 = vpop.eup %2733  ;;  %1457 = vadd.xlane.f32.xlu1 %v2732_v55 }
 0x528   : > { %1455 = vadd.xlane.f32.xlu0 %v2734_v51  ;;  %v1982_v51 = vshrl.u32 %v1658_v43, 7  ;;  %v2009_v43 = vstv %s2008_s13 }
 0x52c   : > { %1390 = vmax.xlane.f32.xlu0 %v1389_v54  ;;  %v1985_v54 = vadd.s32 4294967288, %v3695_v13 }
 0x5b0   : > { %v1454_v50 = vpop.xlane.xlu1 %1453 }
 0x5b1   : > { %v1452_v23 = vpop.xlane.xlu0 %1451  ;;  %2735 = vlog2.f32 %v1454_v50  ;;  %v1983_v50 = vsub.s32 %v3695_v13, %v1982_v51 }
 0x5b2   : > { %2737 = vlog2.f32 %v1452_v23 }
 0x5b4   : > { %v1458_v63 = vpop.xlane.xlu1 %1457 }
 0x5b5   : > { %v1456_v60 = vpop.xlane.xlu0 %1455  ;;  %2739 = vlog2.f32 %v1458_v63  ;;  %v1988_v63 = vsub.s32 %v1985_v54, %v1982_v51 }
 0x5b6   : > { %2741 = vlog2.f32 %v1456_v60 }
 0x5b9   : > { %v1391_v20 = vpop.xlane.xlu0 %1390 }
 0x5ba   : > { %v1392_v46 = vsub.f32 %v3755_v14, %v1391_v20 }
 0x5bb   : > { %v2736_v16 = vpop.eup %2735 }
 0x5bc   : > { %v2738_v4 = vpop.eup %2737  ;;  %v1462_v49 = vmul.f32 0.6931472, %v2736_v16  ;;  %v1393_v10 = vmul.f32 1.442695, %v1392_v46 }
 0x5bd   : > { %v1460_v12 = vmul.f32 0.6931472, %v2738_v4 }
 0x5be   : > { %v1468_v36 = vsub.f32 %v1440_v1, %v1462_v49  ;;  %2743 = vpow2.f32 %v1393_v10 }
 0x5bf   : > { %v2740_v18 = vpop.eup %2739  ;;  %v1467_v7 = vsub.f32 %v1439_v3, %v1460_v12 }
 0x5c0   : > { %v2742_v39 = vpop.eup %2741  ;;  %v1466_v45 = vmul.f32 0.6931472, %v2740_v18 }
 0x5c1   : > { %v1464_v6 = vmul.f32 0.6931472, %v2742_v39 }
 0x5c2   : > { %v1470_v24 = vsub.f32 %v1442_v31, %v1466_v45  ;;  %v1401_v31 = vsub.f32 0.0, %v1383_v42 }
 0x5c3   : > { %v1469_v11 = vsub.f32 %v1441_v48, %v1464_v6 }
 0x5c8   : > { %v2744_v19 = vpop.eup %2743 }
 0x5c9   : > { %v1395_v59 = vsel %vm1388_vm1, %v2744_v19, 0.0 }
 0x5e8   : > { %v2392_v62 = vpop.f32.mrb[4].mxu1 }
 0x5e9   : > { %v2357_v26 = vpop.f32.mrb[4].mxu0  ;;  %v1922_v33 = vpop.f32.mrb[5].mxu1  ;;  %v1934_v61 = vsub.f32 0.0, %v2392_v62 }
 0x5ea   : > { %v1932_v32 = vsub.f32 0.0, %v2357_v26  ;;  %v1847_v17 = vpop.f32.mrb[5].mxu0  ;;  %v1933_v27 = vsub.f32 0.0, %v1922_v33 }
 0x5eb   : > { %v1931_v34 = vsub.f32 0.0, %v1847_v17  ;;  %v1938_v40 = vmul.f32 %v1934_v61, %v1470_v24 }
 0x5ec   : > { %v1936_v56 = vmul.f32 %v1932_v32, %v1468_v36  ;;  %v1937_v9 = vmul.f32 %v1933_v27, %v1469_v11 }
 0x5ed   : > { %v1935_v21 = vmul.f32 %v1931_v34, %v1467_v7 }
 0x5ee   : > { %1941 = vadd.xlane.f32.xlu0 %v1936_v56 }
 0x5ef   : > { %1939 = vadd.xlane.f32.xlu1 %v1935_v21 }
 0x5f2   : > { %1945 = vadd.xlane.f32.xlu0 %v1938_v40 }
 0x5f3   : > { %1943 = vadd.xlane.f32.xlu1 %v1937_v9 }
 0x604   : > { %1953 = vbcast.lane.b32.xlu1 %v2220_v53, 256 }
 0x608   : > { %1957 = vbcast.lane.b32.xlu0 %v2220_v53, 264 }
 0x628   : > { %1396 = vadd.xlane.f32.xlu1 %v1395_v59 }
 0x67b   : > { %v1942_v28 = vpop.xlane.xlu0 %1941 }
 0x67c   : > { %v1940_v25 = vpop.xlane.xlu1 %1939 }
 0x67f   : > { %v1946_v47 = vpop.xlane.xlu0 %1945 }
 0x680   : > { %v1944_v30 = vpop.xlane.xlu1 %1943 }
 0x683   : > { %v1958_v52 = vpop.permute.xlu0 %1957 }
 0x684   : > { %v1962_v35 = vmul.f32 %v1958_v52, %v1942_v28  ;;  %v1954_v15 = vpop.permute.xlu1 %1953  ;;  %v1964_v37 = vmul.f32 %v1958_v52, %v1946_v47 }
 0x685   : > { %v1961_v38 = vmul.f32 %v1954_v15, %v1940_v25  ;;  %v1963_v1 = vmul.f32 %v1954_v15, %v1944_v30 }
 0x686   : > { %1973 = vperm.xlu0 %2716, %v1962_v35  }
 0x68a   : > { %1970 = vperm.xlu0 %2716, %v1961_v38  }
 0x68e   : > { %1976 = vperm.xlu0 %2716, %v1963_v1  }
 0x692   : > { %1979 = vperm.xlu0 %2716, %v1964_v37  }
 0x6b5   : > { %v1397_v3 = vpop.xlane.xlu1 %1396 }
 0x6b6   : > { %2745 = vlog2.f32 %v1397_v3 }
 0x6b7   : > { %2747 = vrcp.f32 %v2009_v43 }
 0x6c0   : > { %v2746_v5 = vpop.eup %2745 }
 0x6c1   : > { %v1399_v58 = vmul.f32 0.6931472, %v2746_v5  ;;  %v2748_v13 = vpop.eup %2747 }
 0x6c3   : > { %v1400_v22 = vsub.f32 %v1392_v46, %v1399_v58 }
 0x6c5   : > { %v1402_v48 = vmul.f32 %v1401_v31, %v1400_v22 }
 0x6c7   : > { %v1403_v41 = vsel %vm1388_vm1, %v1402_v48, 0.0 }
 0x6c8   : > { %1404 = vadd.xlane.f32.xlu1 %v1403_v41 }
 0x6cc   : > { %1410 = vadd.xlane.f32.xlu1 %v1409_v8 }
 0x705   : > { %v1974_v44 = vpop.permute.xlu0 %1973 }
 0x706   : > { %v1989_v4 = vrot.slane %v1974_v44, %v1988_v63 }
 0x709   : > { %v1971_v55 = vpop.permute.xlu0 %1970 }
 0x70a   : > { %v1984_v60 = vrot.slane %v1971_v55, %v1983_v50 }
 0x70c   : > { %v1991_v18 = vsel %vm1990_vm3, %v1989_v4, %v1984_v60 }
 0x70d   : > { %v1977_v23 = vpop.permute.xlu0 %1976 }
 0x70e   : > { %v1995_v14 = vrot.slane %v1977_v23, %v1983_v50 }
 0x711   : > { %v1980_v16 = vpop.permute.xlu0 %1979 }
 0x712   : > { %v1999_v49 = vrot.slane %v1980_v16, %v1988_v63 }
 0x714   : > { %v2000_v12 = vsel %vm1990_vm3, %v1999_v49, %v1995_v14 }
 0x715   : > { %v2002_v39 = vsel %vm2001_vm4, %v2000_v12, %v1991_v18 }
 0x716   : > { %v2005_v62 = vsel %vm2004_vm5, %v2002_v39, 0.0 }
 0x717   : > { %2006 = vadd.xlane.f32.xlu0 %v2005_v62 }
 0x755   : > { %v1405_v26 = vpop.xlane.xlu1 %1404 }
 0x756   : > { %v1406_v32 = vmul.f32 0.5, %v1405_v26 }
 0x759   : > { %v1411_v36 = vpop.xlane.xlu1 %1410 }
 0x75a   : > { %v1412_v34 = vrot.slane %v1411_v36, 4 }
 0x75c   : > { %v1413_v61 = vadd.f32 %v1412_v34, %v1411_v36 }
 0x75e   : > { %v1414_v56 = vrot.slane %v1413_v61, 2 }
 0x760   : > { %v1415_v27 = vadd.f32 %v1414_v56, %v1413_v61 }
 0x762   : > { %v1416_v21 = vrot.slane %v1415_v27, 1 }
 0x764   : > { %v1417_v24 = vadd.f32 %v1416_v21, %v1415_v27 }
 0x766   : > { %2457 = vpush %v1417_v24 }
 0x797   : > { %s2458_s15 = spop %2457 }
 0x798   : > { %s1421_s19 = smul.f32 0.00390625, %s2458_s15 }
 0x79a   : > { %s1422_s21 = smul.f32 0.005, %s1421_s19 }
 0x7a4   : > { %v2007_v33 = vpop.xlane.xlu0 %2006 }
 0x7a5   : > { %v2011_v45 = vmul.f32 %v2748_v13, %v2007_v33 }
 0x7a7   : > { %v2012_v17 = vmul.f32 0.5, %v2011_v45 }
 0x7a9   : > { %v2013_v6 = vadd.f32 %v2012_v17, %v1406_v32 }
 0x7ab   : > { %v2015_v7 = vsel %vm2014_vm6, %v2013_v6, 0.0 }
 0x7ac   : > { %2016 = vadd.xlane.f32.xlu1 %v2015_v7 }
 0x839   : > { %v2017_v11 = vpop.xlane.xlu1 %2016 }
 0x83a   : > { %v2018_v40 = vrot.slane %v2017_v11, 4 }
 0x83c   : > { %v2019_v9 = vadd.f32 %v2018_v40, %v2017_v11 }
 0x83e   : > { %v2020_v2 = vrot.slane %v2019_v9, 2 }
 0x840   : > { %v2021_v53 = vadd.f32 %v2020_v2, %v2019_v9 }
 0x842   : > { %v2022_v29 = vrot.slane %v2021_v53, 1 }
 0x844   : > { %v2023_v20 = vadd.f32 %v2022_v29, %v2021_v53 }
 0x846   : > { %2459 = vpush %v2023_v20 }
 0x876   : > { %2032 = sbr.rel (%p2206_p2) target bundleno = 2174 (0x87e), region = 68 }
 0x877   : > { %s2460_s22 = spop %2459 }
 0x878   : > { %s2027_s14 = smul.f32 0.5, %s2460_s22 }
 0x87a   : > { %s2028_s18 = sadd.f32 %s2027_s14, %s1422_s21 }
 0x87c   : > { %v2029_v46 = vstv %s2028_s18 }
 0x87d   : > { %2033 = vst [vmem:[%s2991_s17] sm:$0xff] %v2029_v46 }
 0x87e PF: > { %p2222_p3 = scmp.eq.s32.totalorder %s2816_s1, 0 }
 0x880   : > { %2037 = sbr.rel (%p2222_p3) target bundleno = 2184 (0x888), region = 72 }
 0x884   : > { %v2038_v10 = vld [vmem:[%s2991_s17] sm:$0xff] (!%p2222_p3) }
 0x885   : > { %v2039_v19 = vadd.f32 (!%p2222_p3), %v2038_v10, %v2029_v46 }
 0x887   : > { %2040 = vst [vmem:[%s2991_s17] sm:$0xff] %v2039_v19 }
 0x888 PF: > { %s32_s29 = sadd.s32 1, %s2832_s29   ;;  %s3872_s2 = sld [smem:[#allocation12_spill]] }
 0x889   : > { %p29_p4 = scmp.ge.s32.totalorder %s32_s29, 8   ;;  %s3873_s23 = sld [smem:[#allocation13_spill]] }
 0x88a   : > { %s3874_s1 = smov %s2824_s27  ;;  %s3875_s26 = smov %s2828_s28 }
 0x88b   :  { %31 = sbr.rel (!%p29_p4) target bundleno = 31 (0x1f), region = 118 }
 0x88e   : > { %s3876_s27 = smov %s3872_s2 }
 0x88f   : > { %s3877_s28 = smov %s3873_s23 }
 0x892   :  { %2060 = vsyncpa [#allocation9], 1 }
 0x893   :  { %2062 = vsyncpa [#allocation9 + $0x1], 1 }

</bundles_post_ra>
